<compile_context>
chip_gen: v7x
topology: tpu7x:2x2x1
jax: 0.10.0
libtpu: 0.0.40
codegen_flags: <defaults>
</compile_context>

<pallas_src>
import functools

import numpy as np

import jax
import jax.numpy as jnp
from jax.experimental import pallas as pl
from jax.experimental.pallas import tpu as pltpu

_K = 5  # LeNet conv kernel size


# ----------------------------------------------------------------------------
# In-kernel building blocks
# ----------------------------------------------------------------------------
def _conv_relu(a, w_ref, b_ref):
    """Fused-K banded conv + bias + ReLU.

    a:      (R_in, L) f32 value; rows = (image, h) blocks, lanes = (w, cin).
    w_ref:  (K*L, Wo*Cout) bf16 banded weight (all K row taps stacked).
    b_ref:  (1, Wo*Cout) f32 bias, tiled per output column.
    Returns (R_in - K + 1, Wo*Cout) f32.  Output rows whose window crosses an
    image boundary are junk but finite; they are dropped downstream.
    """
    r_out = a.shape[0] - (_K - 1)
    # Lane-concatenate the K sublane-shifted views -> one wide-K MXU matmul.
    lhs = jnp.concatenate([a[di:di + r_out, :] for di in range(_K)], axis=1)
    acc = jnp.dot(lhs.astype(jnp.bfloat16), w_ref[...],
                  preferred_element_type=jnp.float32)
    return jnp.maximum(acc + b_ref[...], 0.0)


def _hpool(c, sh_ref):
    """Width-direction half of the 2x2 max-pool via two 0/1 lane selectors."""
    cb = c.astype(jnp.bfloat16)                 # selectors are 0/1 -> exact
    he = jnp.dot(cb, sh_ref[0], preferred_element_type=jnp.float32)
    ho = jnp.dot(cb, sh_ref[1], preferred_element_type=jnp.float32)
    return jnp.maximum(he, ho)


def _make_kernel(bn):
    """Kernel processing a block of `bn` images (static at trace time)."""
    R1, R2, R3 = bn * 32, bn * 16, bn * 8      # rows per stage

    def kernel(x_ref, wb1_ref, b1_ref, sh1_ref, wb3_ref, b3_ref, sh3_ref,
               wb5_ref, b5_ref, w6_ref, b6_ref, wo_ref, bo_ref,
               out_ref, a1_s, h1_s, h3_s, c5_s):
        # ---- in-kernel vertical zero padding of the input ------------------
        # a1_s: 32 rows per image = [2 zero | 28 image rows | 2 zero], 28 lanes.
        # (horizontal pad=2 is baked into wb1 instead of padding lanes.)
        a1_s[...] = jnp.zeros(a1_s.shape, a1_s.dtype)
        for n in range(bn):                     # static unroll over the block
            a1_s[pl.ds(n * 32 + 2, 28), :] = x_ref[pl.ds(n * 28, 28), :]

        # ---- C1 (pad=2) + ReLU + 2x2 max-pool -------------------------------
        c1 = _conv_relu(a1_s[...], wb1_ref, b1_ref)          # (R1-4, 168)
        h1 = _hpool(c1, sh1_ref)                              # (R1-4, 84)
        h1_s[pl.ds(0, R1 - 4), :] = h1
        h1_s[pl.ds(R1 - 4, _K - 1), :] = jnp.zeros((_K - 1, h1.shape[1]),
                                                   jnp.float32)
        a2 = jnp.maximum(h1_s[pl.ds(0, R2, stride=2), :],     # even rows
                         h1_s[pl.ds(1, R2, stride=2), :])     # odd rows

        # ---- C3 (pad=0) + ReLU + 2x2 max-pool -------------------------------
        c3 = _conv_relu(a2, wb3_ref, b3_ref)                  # (R2-4, 160)
        h3 = _hpool(c3, sh3_ref)                              # (R2-4, 80)
        h3_s[pl.ds(0, R2 - 4), :] = h3
        h3_s[pl.ds(R2 - 4, _K - 1), :] = jnp.zeros((_K - 1, h3.shape[1]),
                                                   jnp.float32)
        a3 = jnp.maximum(h3_s[pl.ds(0, R3, stride=2), :],
                         h3_s[pl.ds(1, R3, stride=2), :])     # (R3, 80)

        # ---- C5 (5x5 -> 1x1) + ReLU, flatten via stride-8 row read ----------
        c5 = _conv_relu(a3, wb5_ref, b5_ref)                  # (R3-4, 120)
        c5_s[pl.ds(0, R3 - 4), :] = c5
        feat = c5_s[pl.ds(0, bn, stride=8), :]                # (bn, 120)

        # ---- F6 + ReLU, OUT (tiny GEMMs, kept f32 for accuracy) -------------
        f6 = jnp.maximum(
            jnp.dot(feat, w6_ref[...], preferred_element_type=jnp.float32)
            + b6_ref[...], 0.0)                               # (bn, 84)
        out = jnp.dot(f6, wo_ref[...],
                      preferred_element_type=jnp.float32) + bo_ref[...]
        out_ref[...] = out.astype(out_ref.dtype)

    return kernel


# ----------------------------------------------------------------------------
# One-time host-side operand preparation (batch-size independent)
# ----------------------------------------------------------------------------
def _conv_banded_fused(w, w_in, pad):
    """PyTorch conv weight (Cout,Cin,K,K) -> fused banded (K*Win*Cin, Wo*Cout).

    Horizontal padding `pad` is baked in by clipping out-of-range taps.
    """
    w = np.asarray(w, np.float32)
    cout, cin, k, _ = w.shape
    w_out = w_in + 2 * pad - k + 1
    lanes = w_in * cin
    wb = np.zeros((k * lanes, w_out * cout), np.float32)
    for di in range(k):
        for dj in range(k):
            blk = w[:, :, di, dj].T                       # (Cin, Cout)
            for xo in range(w_out):
                xin = xo + dj - pad
                if 0 <= xin < w_in:
                    wb[di * lanes + xin * cin: di * lanes + (xin + 1) * cin,
                       xo * cout:(xo + 1) * cout] = blk
    return wb


def _hpool_select(wo, cout):
    """Even/odd column (width) selectors: (2, Wo*Cout, (Wo//2)*Cout)."""
    w2 = wo // 2
    sh = np.zeros((2, wo * cout, w2 * cout), np.float32)
    eye = np.eye(cout, dtype=np.float32)
    for p in range(2):
        for x2 in range(w2):
            sh[p, (2 * x2 + p) * cout:(2 * x2 + p + 1) * cout,
               x2 * cout:(x2 + 1) * cout] = eye
    return sh


def prepare_operands(params):
    """Build all VMEM-resident kernel operands once (batch independent)."""
    (w1, b1), (w3, b3), (w5, b5) = params["C1"], params["C3"], params["C5"]
    (w6, b6), (wo_, bo_) = params["F6"], params["OUT"]
    bf16, f32 = jnp.bfloat16, jnp.float32
    ops = {
        # C1: 28x28x1 (pad=2 in-weight / in-kernel) -> 28x28x6
        "wb1": jnp.asarray(_conv_banded_fused(w1, 28, 2), bf16),  # (140, 168)
        "b1": jnp.asarray(np.tile(np.asarray(b1, np.float32), 28)[None, :], f32),
        "sh1": jnp.asarray(_hpool_select(28, 6), bf16),           # (2,168,84)
        # C3: 14x14x6 -> 10x10x16
        "wb3": jnp.asarray(_conv_banded_fused(w3, 14, 0), bf16),  # (420, 160)
        "b3": jnp.asarray(np.tile(np.asarray(b3, np.float32), 10)[None, :], f32),
        "sh3": jnp.asarray(_hpool_select(10, 16), bf16),          # (2,160,80)
        # C5: 5x5x16 -> 1x1x120
        "wb5": jnp.asarray(_conv_banded_fused(w5, 5, 0), bf16),   # (400, 120)
        "b5": jnp.asarray(np.asarray(b5, np.float32)[None, :], f32),
        # FC weights pre-transposed to (in, out); kept f32 (tiny tail GEMMs)
        "w6": jnp.asarray(np.asarray(w6, np.float32).T, f32),     # (120, 84)
        "b6": jnp.asarray(np.asarray(b6, np.float32)[None, :], f32),
        "wo": jnp.asarray(np.asarray(wo_, np.float32).T, f32),    # (84, 10)
        "bo": jnp.asarray(np.asarray(bo_, np.float32)[None, :], f32),
    }
    return ops


def _resident_spec(shape):
    """Full-array block with a constant index map: stays VMEM-resident."""
    return pl.BlockSpec(shape, lambda i, _n=len(shape): (0,) * _n)


# ----------------------------------------------------------------------------
# Forward pass: one pallas_call, batch sharded over a 1-D "parallel" grid
# ----------------------------------------------------------------------------
@functools.partial(jax.jit, static_argnames=("block_n",))
def lenet_forward(ops, x, block_n=None):
    n = x.shape[0]
    bn = block_n if block_n is not None else (n if n <= 8 else 8)
    assert n % bn == 0, "batch must be divisible by the per-block image count"

    x2d = x.reshape(n * 28, 28)            # rows = (image, h), lanes = w

    weight_names = ("wb1", "b1", "sh1", "wb3", "b3", "sh3",
                    "wb5", "b5", "w6", "b6", "wo", "bo")
    in_specs = [pl.BlockSpec((bn * 28, 28), lambda i: (i, 0))]
    in_specs += [_resident_spec(tuple(ops[name].shape)) for name in weight_names]

    return pl.pallas_call(
        _make_kernel(bn),
        out_shape=jax.ShapeDtypeStruct((n, 10), jnp.float32),
        grid=(n // bn,),
        in_specs=in_specs,
        out_specs=pl.BlockSpec((bn, 10), lambda i: (i, 0)),
        scratch_shapes=[
            pltpu.VMEM((bn * 32, 28), jnp.float32),   # padded input slab
            pltpu.VMEM((bn * 32, 84), jnp.float32),   # C1 + width-pool
            pltpu.VMEM((bn * 16, 80), jnp.float32),   # C3 + width-pool
            pltpu.VMEM((bn * 8, 120), jnp.float32),   # C5 output (pre-flatten)
        ],
        compiler_params=pltpu.CompilerParams(
            dimension_semantics=("parallel",),        # shard batch on v7x cores
            vmem_limit_bytes=32 * 1024 * 1024),
    )(x2d, *[ops[name] for name in weight_names])


# ----------------------------------------------------------------------------
# Parameter init (PyTorch-style) and a pure-JAX reference for self-checking
# ----------------------------------------------------------------------------
def init_params(key):
    keys = jax.random.split(key, 5)

    def conv_p(k, cout, cin, kh, kw):
        kw_, kb_ = jax.random.split(k)
        bound = 1.0 / jnp.sqrt(cin * kh * kw)
        w = jax.random.uniform(kw_, (cout, cin, kh, kw), jnp.float32, -bound, bound)
        b = jax.random.uniform(kb_, (cout,), jnp.float32, -bound, bound)
        return w, b

    def lin_p(k, out_f, in_f):
        kw_, kb_ = jax.random.split(k)
        bound = 1.0 / jnp.sqrt(in_f)
        w = jax.random.uniform(kw_, (out_f, in_f), jnp.float32, -bound, bound)
        b = jax.random.uniform(kb_, (out_f,), jnp.float32, -bound, bound)
        return w, b

    return {
        "C1": conv_p(keys[0], 6, 1, 5, 5),
        "C3": conv_p(keys[1], 16, 6, 5, 5),
        "C5": conv_p(keys[2], 120, 16, 5, 5),
        "F6": lin_p(keys[3], 84, 120),
        "OUT": lin_p(keys[4], 10, 84),
    }


def lenet_reference(params, x):
    hp = jax.lax.Precision.HIGHEST

    def conv(y, w, b, pad):
        y = jax.lax.conv_general_dilated(
            y, w, (1, 1), [(pad, pad), (pad, pad)],
            dimension_numbers=("NCHW", "OIHW", "NCHW"), precision=hp)
        return y + b.reshape(1, -1, 1, 1)

    def pool(y):
        return jax.lax.reduce_window(y, -jnp.inf, jax.lax.max,
                                     (1, 1, 2, 2), (1, 1, 2, 2), "VALID")

    y = pool(jax.nn.relu(conv(x, *params["C1"], 2)))
    y = pool(jax.nn.relu(conv(y, *params["C3"], 0)))
    y = jax.nn.relu(conv(y, *params["C5"], 0)).reshape(x.shape[0], -1)
    y = jax.nn.relu(jnp.dot(y, params["F6"][0].T, precision=hp) + params["F6"][1])
    return jnp.dot(y, params["OUT"][0].T, precision=hp) + params["OUT"][1]


if __name__ == "__main__":
    key = jax.random.PRNGKey(0)
    pkey, xkey = jax.random.split(key)
    params = init_params(pkey)

    ops = prepare_operands(params)       # one-time, batch-independent

    batch = 2
    # LeNet geometry requires 28x28 single-channel input (so C5 -> 1x1x120).
    x = jax.random.normal(xkey, (batch, 1, 28, 28), dtype=jnp.float32)

    out = jax.block_until_ready(lenet_forward(ops, x))
    assert out.shape == (batch, 10), out.shape

    ref = jax.block_until_ready(lenet_reference(params, x))
    err = float(jnp.max(jnp.abs(out - ref)))
    # Loose tolerance: conv/pool matmuls use bf16 MXU operands (f32 accum).
    assert err < 5e-2, f"kernel/reference mismatch: max abs err = {err}"

    print("KERNEL_OK")
</pallas_src>

<mosaic_0001>
module attributes {stable_mosaic.version = 11 : i64} {
  func.func @kernel(%arg0: i32, %arg1: memref<56x28xf32, #tpu.memory_space<vmem>>, %arg2: memref<140x168xbf16, #tpu.memory_space<vmem>>, %arg3: memref<1x168xf32, #tpu.memory_space<vmem>>, %arg4: memref<2x168x84xbf16, #tpu.memory_space<vmem>>, %arg5: memref<420x160xbf16, #tpu.memory_space<vmem>>, %arg6: memref<1x160xf32, #tpu.memory_space<vmem>>, %arg7: memref<2x160x80xbf16, #tpu.memory_space<vmem>>, %arg8: memref<400x120xbf16, #tpu.memory_space<vmem>>, %arg9: memref<1x120xf32, #tpu.memory_space<vmem>>, %arg10: memref<120x84xf32, #tpu.memory_space<vmem>>, %arg11: memref<1x84xf32, #tpu.memory_space<vmem>>, %arg12: memref<84x10xf32, #tpu.memory_space<vmem>>, %arg13: memref<1x10xf32, #tpu.memory_space<vmem>>, %arg14: memref<2x10xf32, #tpu.memory_space<vmem>>, %arg15: memref<64x28xf32, #tpu.memory_space<vmem>>, %arg16: memref<64x84xf32, #tpu.memory_space<vmem>>, %arg17: memref<32x80xf32, #tpu.memory_space<vmem>>, %arg18: memref<16x120xf32, #tpu.memory_space<vmem>>) attributes {dimension_semantics = [#tpu.dimension_semantics<parallel>], iteration_bounds = array<i64: 1>, scalar_prefetch = 0 : i64, scratch_operands = 4 : i64, tpu.core_type = #tpu.core_type<tc>, window_params = [{transform_indices = @transform_0, window_bounds = array<i64: 56, 28>}, {pipeline_mode = #tpu.pipeline_mode<synchronous>, transform_indices = @transform_1, window_bounds = array<i64: 140, 168>}, {pipeline_mode = #tpu.pipeline_mode<synchronous>, transform_indices = @transform_2, window_bounds = array<i64: 1, 168>}, {pipeline_mode = #tpu.pipeline_mode<synchronous>, transform_indices = @transform_3, window_bounds = array<i64: 2, 168, 84>}, {pipeline_mode = #tpu.pipeline_mode<synchronous>, transform_indices = @transform_4, window_bounds = array<i64: 420, 160>}, {pipeline_mode = #tpu.pipeline_mode<synchronous>, transform_indices = @transform_5, window_bounds = array<i64: 1, 160>}, {pipeline_mode = #tpu.pipeline_mode<synchronous>, transform_indices = @transform_6, window_bounds = array<i64: 2, 160, 80>}, {pipeline_mode = #tpu.pipeline_mode<synchronous>, transform_indices = @transform_7, window_bounds = array<i64: 400, 120>}, {pipeline_mode = #tpu.pipeline_mode<synchronous>, transform_indices = @transform_8, window_bounds = array<i64: 1, 120>}, {pipeline_mode = #tpu.pipeline_mode<synchronous>, transform_indices = @transform_9, window_bounds = array<i64: 120, 84>}, {pipeline_mode = #tpu.pipeline_mode<synchronous>, transform_indices = @transform_10, window_bounds = array<i64: 1, 84>}, {pipeline_mode = #tpu.pipeline_mode<synchronous>, transform_indices = @transform_11, window_bounds = array<i64: 84, 10>}, {pipeline_mode = #tpu.pipeline_mode<synchronous>, transform_indices = @transform_12, window_bounds = array<i64: 1, 10>}, {transform_indices = @transform_13, window_bounds = array<i64: 2, 10>}]} {
    %cst = arith.constant 0.000000e+00 : f32
    %0 = vector.broadcast %cst : f32 to vector<64x28xf32>
    %c0 = arith.constant 0 : index
    %c0_0 = arith.constant 0 : index
    %1 = vector.load %arg15[%c0, %c0_0] : memref<64x28xf32, #tpu.memory_space<vmem>>, vector<64x28xf32>
    tpu.vector_store %arg15[%c0, %c0_0], %0 {strides = array<i32>} : memref<64x28xf32, #tpu.memory_space<vmem>>, vector<64x28xf32>,
    %c0_1 = arith.constant 0 : index
    %c0_2 = arith.constant 0 : index
    %2 = vector.load %arg1[%c0_1, %c0_2] : memref<56x28xf32, #tpu.memory_space<vmem>>, vector<28x28xf32>
    %c2 = arith.constant 2 : index
    %c0_3 = arith.constant 0 : index
    %3 = vector.load %arg15[%c2, %c0_3] : memref<64x28xf32, #tpu.memory_space<vmem>>, vector<28x28xf32>
    tpu.vector_store %arg15[%c2, %c0_3], %2 {strides = array<i32>} : memref<64x28xf32, #tpu.memory_space<vmem>>, vector<28x28xf32>,
    %c28 = arith.constant 28 : index
    %c0_4 = arith.constant 0 : index
    %4 = vector.load %arg1[%c28, %c0_4] : memref<56x28xf32, #tpu.memory_space<vmem>>, vector<28x28xf32>
    %c34 = arith.constant 34 : index
    %c0_5 = arith.constant 0 : index
    %5 = vector.load %arg15[%c34, %c0_5] : memref<64x28xf32, #tpu.memory_space<vmem>>, vector<28x28xf32>
    tpu.vector_store %arg15[%c34, %c0_5], %4 {strides = array<i32>} : memref<64x28xf32, #tpu.memory_space<vmem>>, vector<28x28xf32>,
    %c0_6 = arith.constant 0 : index
    %c0_7 = arith.constant 0 : index
    %6 = vector.load %arg15[%c0_6, %c0_7] : memref<64x28xf32, #tpu.memory_space<vmem>>, vector<64x28xf32>
    %7 = vector.extract_strided_slice %6 {offsets = [0, 0], sizes = [60, 28], strides = [1, 1]} : vector<64x28xf32> to vector<60x28xf32>
    %8 = vector.extract_strided_slice %6 {offsets = [1, 0], sizes = [60, 28], strides = [1, 1]} : vector<64x28xf32> to vector<60x28xf32>
    %9 = vector.extract_strided_slice %6 {offsets = [2, 0], sizes = [60, 28], strides = [1, 1]} : vector<64x28xf32> to vector<60x28xf32>
    %10 = vector.extract_strided_slice %6 {offsets = [3, 0], sizes = [60, 28], strides = [1, 1]} : vector<64x28xf32> to vector<60x28xf32>
    %11 = vector.extract_strided_slice %6 {offsets = [4, 0], sizes = [60, 28], strides = [1, 1]} : vector<64x28xf32> to vector<60x28xf32>
    %12 = tpu.concatenate %7, %8, %9, %10, %11 in 1 : vector<60x28xf32>, vector<60x28xf32>, vector<60x28xf32>, vector<60x28xf32>, vector<60x28xf32> -> vector<60x140xf32>
    %13 = arith.truncf %12 : vector<60x140xf32> to vector<60x140xbf16>
    %c0_8 = arith.constant 0 : index
    %c0_9 = arith.constant 0 : index
    %14 = vector.load %arg2[%c0_8, %c0_9] : memref<140x168xbf16, #tpu.memory_space<vmem>>, vector<140x168xbf16>
    %cst_10 = arith.constant dense<0.000000e+00> : vector<60x168xf32>
    %15 = tpu.matmul %13, %14, %cst_10 {dimension_numbers = #tpu.dot_dimension_numbers<[1], [0], [0], [1], [0, 0, 1, 1], [], []>} : vector<60x140xbf16>, vector<140x168xbf16>, vector<60x168xf32> -> vector<60x168xf32>
    %c0_11 = arith.constant 0 : index
    %c0_12 = arith.constant 0 : index
    %16 = vector.load %arg3[%c0_11, %c0_12] : memref<1x168xf32, #tpu.memory_space<vmem>>, vector<1x168xf32>
    %17 = vector.broadcast %16 : vector<1x168xf32> to vector<60x168xf32>
    %18 = arith.addf %15, %17 : vector<60x168xf32>
    %cst_13 = arith.constant 0.000000e+00 : f32
    %19 = vector.broadcast %cst_13 : f32 to vector<60x168xf32>
    %20 = arith.maximumf %18, %19 : vector<60x168xf32>
    %21 = arith.truncf %20 : vector<60x168xf32> to vector<60x168xbf16>
    %c0_14 = arith.constant 0 : index
    %c0_15 = arith.constant 0 : index
    %c0_16 = arith.constant 0 : index
    %22 = vector.load %arg4[%c0_14, %c0_15, %c0_16] : memref<2x168x84xbf16, #tpu.memory_space<vmem>>, vector<1x168x84xbf16>
    %23 = vector.shape_cast %22 : vector<1x168x84xbf16> to vector<168x84xbf16>
    %cst_17 = arith.constant dense<0.000000e+00> : vector<60x84xf32>
    %24 = tpu.matmul %21, %23, %cst_17 {dimension_numbers = #tpu.dot_dimension_numbers<[1], [0], [0], [1], [0, 0, 1, 1], [], []>} : vector<60x168xbf16>, vector<168x84xbf16>, vector<60x84xf32> -> vector<60x84xf32>
    %c1 = arith.constant 1 : index
    %c0_18 = arith.constant 0 : index
    %c0_19 = arith.constant 0 : index
    %25 = vector.load %arg4[%c1, %c0_18, %c0_19] : memref<2x168x84xbf16, #tpu.memory_space<vmem>>, vector<1x168x84xbf16>
    %26 = vector.shape_cast %25 : vector<1x168x84xbf16> to vector<168x84xbf16>
    %cst_20 = arith.constant dense<0.000000e+00> : vector<60x84xf32>
    %27 = tpu.matmul %21, %26, %cst_20 {dimension_numbers = #tpu.dot_dimension_numbers<[1], [0], [0], [1], [0, 0, 1, 1], [], []>} : vector<60x168xbf16>, vector<168x84xbf16>, vector<60x84xf32> -> vector<60x84xf32>
    %28 = arith.maximumf %24, %27 : vector<60x84xf32>
    %c0_21 = arith.constant 0 : index
    %c0_22 = arith.constant 0 : index
    %29 = vector.load %arg16[%c0_21, %c0_22] : memref<64x84xf32, #tpu.memory_space<vmem>>, vector<60x84xf32>
    tpu.vector_store %arg16[%c0_21, %c0_22], %28 {strides = array<i32>} : memref<64x84xf32, #tpu.memory_space<vmem>>, vector<60x84xf32>,
    %cst_23 = arith.constant 0.000000e+00 : f32
    %30 = vector.broadcast %cst_23 : f32 to vector<4x84xf32>
    %c60 = arith.constant 60 : index
    %c0_24 = arith.constant 0 : index
    %31 = vector.load %arg16[%c60, %c0_24] : memref<64x84xf32, #tpu.memory_space<vmem>>, vector<4x84xf32>
    tpu.vector_store %arg16[%c60, %c0_24], %30 {strides = array<i32>} : memref<64x84xf32, #tpu.memory_space<vmem>>, vector<4x84xf32>,
    %c0_25 = arith.constant 0 : index
    %c0_26 = arith.constant 0 : index
    %32 = tpu.strided_load %arg16[%c0_25, %c0_26] {strides = array<i32: 2, 1>} : memref<64x84xf32, #tpu.memory_space<vmem>>, vector<32x84xf32>
    %c1_27 = arith.constant 1 : index
    %c0_28 = arith.constant 0 : index
    %33 = tpu.strided_load %arg16[%c1_27, %c0_28] {strides = array<i32: 2, 1>} : memref<64x84xf32, #tpu.memory_space<vmem>>, vector<32x84xf32>
    %34 = arith.maximumf %32, %33 : vector<32x84xf32>
    %35 = vector.extract_strided_slice %34 {offsets = [0, 0], sizes = [28, 84], strides = [1, 1]} : vector<32x84xf32> to vector<28x84xf32>
    %36 = vector.extract_strided_slice %34 {offsets = [1, 0], sizes = [28, 84], strides = [1, 1]} : vector<32x84xf32> to vector<28x84xf32>
    %37 = vector.extract_strided_slice %34 {offsets = [2, 0], sizes = [28, 84], strides = [1, 1]} : vector<32x84xf32> to vector<28x84xf32>
    %38 = vector.extract_strided_slice %34 {offsets = [3, 0], sizes = [28, 84], strides = [1, 1]} : vector<32x84xf32> to vector<28x84xf32>
    %39 = vector.extract_strided_slice %34 {offsets = [4, 0], sizes = [28, 84], strides = [1, 1]} : vector<32x84xf32> to vector<28x84xf32>
    %40 = tpu.concatenate %35, %36, %37, %38, %39 in 1 : vector<28x84xf32>, vector<28x84xf32>, vector<28x84xf32>, vector<28x84xf32>, vector<28x84xf32> -> vector<28x420xf32>
    %41 = arith.truncf %40 : vector<28x420xf32> to vector<28x420xbf16>
    %c0_29 = arith.constant 0 : index
    %c0_30 = arith.constant 0 : index
    %42 = vector.load %arg5[%c0_29, %c0_30] : memref<420x160xbf16, #tpu.memory_space<vmem>>, vector<420x160xbf16>
    %cst_31 = arith.constant dense<0.000000e+00> : vector<28x160xf32>
    %43 = tpu.matmul %41, %42, %cst_31 {dimension_numbers = #tpu.dot_dimension_numbers<[1], [0], [0], [1], [0, 0, 1, 1], [], []>} : vector<28x420xbf16>, vector<420x160xbf16>, vector<28x160xf32> -> vector<28x160xf32>
    %c0_32 = arith.constant 0 : index
    %c0_33 = arith.constant 0 : index
    %44 = vector.load %arg6[%c0_32, %c0_33] : memref<1x160xf32, #tpu.memory_space<vmem>>, vector<1x160xf32>
    %45 = vector.broadcast %44 : vector<1x160xf32> to vector<28x160xf32>
    %46 = arith.addf %43, %45 : vector<28x160xf32>
    %cst_34 = arith.constant 0.000000e+00 : f32
    %47 = vector.broadcast %cst_34 : f32 to vector<28x160xf32>
    %48 = arith.maximumf %46, %47 : vector<28x160xf32>
    %49 = arith.truncf %48 : vector<28x160xf32> to vector<28x160xbf16>
    %c0_35 = arith.constant 0 : index
    %c0_36 = arith.constant 0 : index
    %c0_37 = arith.constant 0 : index
    %50 = vector.load %arg7[%c0_35, %c0_36, %c0_37] : memref<2x160x80xbf16, #tpu.memory_space<vmem>>, vector<1x160x80xbf16>
    %51 = vector.shape_cast %50 : vector<1x160x80xbf16> to vector<160x80xbf16>
    %cst_38 = arith.constant dense<0.000000e+00> : vector<28x80xf32>
    %52 = tpu.matmul %49, %51, %cst_38 {dimension_numbers = #tpu.dot_dimension_numbers<[1], [0], [0], [1], [0, 0, 1, 1], [], []>} : vector<28x160xbf16>, vector<160x80xbf16>, vector<28x80xf32> -> vector<28x80xf32>
    %c1_39 = arith.constant 1 : index
    %c0_40 = arith.constant 0 : index
    %c0_41 = arith.constant 0 : index
    %53 = vector.load %arg7[%c1_39, %c0_40, %c0_41] : memref<2x160x80xbf16, #tpu.memory_space<vmem>>, vector<1x160x80xbf16>
    %54 = vector.shape_cast %53 : vector<1x160x80xbf16> to vector<160x80xbf16>
    %cst_42 = arith.constant dense<0.000000e+00> : vector<28x80xf32>
    %55 = tpu.matmul %49, %54, %cst_42 {dimension_numbers = #tpu.dot_dimension_numbers<[1], [0], [0], [1], [0, 0, 1, 1], [], []>} : vector<28x160xbf16>, vector<160x80xbf16>, vector<28x80xf32> -> vector<28x80xf32>
    %56 = arith.maximumf %52, %55 : vector<28x80xf32>
    %c0_43 = arith.constant 0 : index
    %c0_44 = arith.constant 0 : index
    %57 = vector.load %arg17[%c0_43, %c0_44] : memref<32x80xf32, #tpu.memory_space<vmem>>, vector<28x80xf32>
    tpu.vector_store %arg17[%c0_43, %c0_44], %56 {strides = array<i32>} : memref<32x80xf32, #tpu.memory_space<vmem>>, vector<28x80xf32>,
    %cst_45 = arith.constant 0.000000e+00 : f32
    %58 = vector.broadcast %cst_45 : f32 to vector<4x80xf32>
    %c28_46 = arith.constant 28 : index
    %c0_47 = arith.constant 0 : index
    %59 = vector.load %arg17[%c28_46, %c0_47] : memref<32x80xf32, #tpu.memory_space<vmem>>, vector<4x80xf32>
    tpu.vector_store %arg17[%c28_46, %c0_47], %58 {strides = array<i32>} : memref<32x80xf32, #tpu.memory_space<vmem>>, vector<4x80xf32>,
    %c0_48 = arith.constant 0 : index
    %c0_49 = arith.constant 0 : index
    %60 = tpu.strided_load %arg17[%c0_48, %c0_49] {strides = array<i32: 2, 1>} : memref<32x80xf32, #tpu.memory_space<vmem>>, vector<16x80xf32>
    %c1_50 = arith.constant 1 : index
    %c0_51 = arith.constant 0 : index
    %61 = tpu.strided_load %arg17[%c1_50, %c0_51] {strides = array<i32: 2, 1>} : memref<32x80xf32, #tpu.memory_space<vmem>>, vector<16x80xf32>
    %62 = arith.maximumf %60, %61 : vector<16x80xf32>
    %63 = vector.extract_strided_slice %62 {offsets = [0, 0], sizes = [12, 80], strides = [1, 1]} : vector<16x80xf32> to vector<12x80xf32>
    %64 = vector.extract_strided_slice %62 {offsets = [1, 0], sizes = [12, 80], strides = [1, 1]} : vector<16x80xf32> to vector<12x80xf32>
    %65 = vector.extract_strided_slice %62 {offsets = [2, 0], sizes = [12, 80], strides = [1, 1]} : vector<16x80xf32> to vector<12x80xf32>
    %66 = vector.extract_strided_slice %62 {offsets = [3, 0], sizes = [12, 80], strides = [1, 1]} : vector<16x80xf32> to vector<12x80xf32>
    %67 = vector.extract_strided_slice %62 {offsets = [4, 0], sizes = [12, 80], strides = [1, 1]} : vector<16x80xf32> to vector<12x80xf32>
    %68 = tpu.concatenate %63, %64, %65, %66, %67 in 1 : vector<12x80xf32>, vector<12x80xf32>, vector<12x80xf32>, vector<12x80xf32>, vector<12x80xf32> -> vector<12x400xf32>
    %69 = arith.truncf %68 : vector<12x400xf32> to vector<12x400xbf16>
    %c0_52 = arith.constant 0 : index
    %c0_53 = arith.constant 0 : index
    %70 = vector.load %arg8[%c0_52, %c0_53] : memref<400x120xbf16, #tpu.memory_space<vmem>>, vector<400x120xbf16>
    %cst_54 = arith.constant dense<0.000000e+00> : vector<12x120xf32>
    %71 = tpu.matmul %69, %70, %cst_54 {dimension_numbers = #tpu.dot_dimension_numbers<[1], [0], [0], [1], [0, 0, 1, 1], [], []>} : vector<12x400xbf16>, vector<400x120xbf16>, vector<12x120xf32> -> vector<12x120xf32>
    %c0_55 = arith.constant 0 : index
    %c0_56 = arith.constant 0 : index
    %72 = vector.load %arg9[%c0_55, %c0_56] : memref<1x120xf32, #tpu.memory_space<vmem>>, vector<1x120xf32>
    %73 = vector.broadcast %72 : vector<1x120xf32> to vector<12x120xf32>
    %74 = arith.addf %71, %73 : vector<12x120xf32>
    %cst_57 = arith.constant 0.000000e+00 : f32
    %75 = vector.broadcast %cst_57 : f32 to vector<12x120xf32>
    %76 = arith.maximumf %74, %75 : vector<12x120xf32>
    %c0_58 = arith.constant 0 : index
    %c0_59 = arith.constant 0 : index
    %77 = vector.load %arg18[%c0_58, %c0_59] : memref<16x120xf32, #tpu.memory_space<vmem>>, vector<12x120xf32>
    tpu.vector_store %arg18[%c0_58, %c0_59], %76 {strides = array<i32>} : memref<16x120xf32, #tpu.memory_space<vmem>>, vector<12x120xf32>,
    %c0_60 = arith.constant 0 : index
    %c0_61 = arith.constant 0 : index
    %78 = tpu.strided_load %arg18[%c0_60, %c0_61] {strides = array<i32: 8, 1>} : memref<16x120xf32, #tpu.memory_space<vmem>>, vector<2x120xf32>
    %c0_62 = arith.constant 0 : index
    %c0_63 = arith.constant 0 : index
    %79 = vector.load %arg10[%c0_62, %c0_63] : memref<120x84xf32, #tpu.memory_space<vmem>>, vector<120x84xf32>
    %cst_64 = arith.constant dense<0.000000e+00> : vector<2x84xf32>
    %80 = tpu.matmul %78, %79, %cst_64 {dimension_numbers = #tpu.dot_dimension_numbers<[1], [0], [0], [1], [0, 0, 1, 1], [], []>} : vector<2x120xf32>, vector<120x84xf32>, vector<2x84xf32> -> vector<2x84xf32>
    %c0_65 = arith.constant 0 : index
    %c0_66 = arith.constant 0 : index
    %81 = vector.load %arg11[%c0_65, %c0_66] : memref<1x84xf32, #tpu.memory_space<vmem>>, vector<1x84xf32>
    %82 = vector.broadcast %81 : vector<1x84xf32> to vector<2x84xf32>
    %83 = arith.addf %80, %82 : vector<2x84xf32>
    %cst_67 = arith.constant 0.000000e+00 : f32
    %84 = vector.broadcast %cst_67 : f32 to vector<2x84xf32>
    %85 = arith.maximumf %83, %84 : vector<2x84xf32>
    %c0_68 = arith.constant 0 : index
    %c0_69 = arith.constant 0 : index
    %86 = vector.load %arg12[%c0_68, %c0_69] : memref<84x10xf32, #tpu.memory_space<vmem>>, vector<84x10xf32>
    %cst_70 = arith.constant dense<0.000000e+00> : vector<2x10xf32>
    %87 = tpu.matmul %85, %86, %cst_70 {dimension_numbers = #tpu.dot_dimension_numbers<[1], [0], [0], [1], [0, 0, 1, 1], [], []>} : vector<2x84xf32>, vector<84x10xf32>, vector<2x10xf32> -> vector<2x10xf32>
    %c0_71 = arith.constant 0 : index
    %c0_72 = arith.constant 0 : index
    %88 = vector.load %arg13[%c0_71, %c0_72] : memref<1x10xf32, #tpu.memory_space<vmem>>, vector<1x10xf32>
    %89 = vector.broadcast %88 : vector<1x10xf32> to vector<2x10xf32>
    %90 = arith.addf %87, %89 : vector<2x10xf32>
    %c0_73 = arith.constant 0 : index
    %c0_74 = arith.constant 0 : index
    %91 = vector.load %arg14[%c0_73, %c0_74] : memref<2x10xf32, #tpu.memory_space<vmem>>, vector<2x10xf32>
    tpu.vector_store %arg14[%c0_73, %c0_74], %90 {strides = array<i32>} : memref<2x10xf32, #tpu.memory_space<vmem>>, vector<2x10xf32>,
    return
  }
  func.func @transform_0(%arg0: i32) -> (i32, i32) {
    %c0_i32 = arith.constant 0 : i32
    %c0_i32_0 = arith.constant 0 : i32
    return %arg0, %c0_i32 : i32, i32
  }
  func.func @transform_1(%arg0: i32) -> (i32, i32) {
    %c0_i32 = arith.constant 0 : i32
    %c0_i32_0 = arith.constant 0 : i32
    %c0_i32_1 = arith.constant 0 : i32
    return %c0_i32, %c0_i32_0 : i32, i32
  }
  func.func @transform_2(%arg0: i32) -> (i32, i32) {
    %c0_i32 = arith.constant 0 : i32
    %c0_i32_0 = arith.constant 0 : i32
    %c0_i32_1 = arith.constant 0 : i32
    return %c0_i32, %c0_i32_0 : i32, i32
  }
  func.func @transform_3(%arg0: i32) -> (i32, i32, i32) {
    %c0_i32 = arith.constant 0 : i32
    %c0_i32_0 = arith.constant 0 : i32
    %c0_i32_1 = arith.constant 0 : i32
    %c0_i32_2 = arith.constant 0 : i32
    return %c0_i32, %c0_i32_0, %c0_i32_1 : i32, i32, i32
  }
  func.func @transform_4(%arg0: i32) -> (i32, i32) {
    %c0_i32 = arith.constant 0 : i32
    %c0_i32_0 = arith.constant 0 : i32
    %c0_i32_1 = arith.constant 0 : i32
    return %c0_i32, %c0_i32_0 : i32, i32
  }
  func.func @transform_5(%arg0: i32) -> (i32, i32) {
    %c0_i32 = arith.constant 0 : i32
    %c0_i32_0 = arith.constant 0 : i32
    %c0_i32_1 = arith.constant 0 : i32
    return %c0_i32, %c0_i32_0 : i32, i32
  }
  func.func @transform_6(%arg0: i32) -> (i32, i32, i32) {
    %c0_i32 = arith.constant 0 : i32
    %c0_i32_0 = arith.constant 0 : i32
    %c0_i32_1 = arith.constant 0 : i32
    %c0_i32_2 = arith.constant 0 : i32
    return %c0_i32, %c0_i32_0, %c0_i32_1 : i32, i32, i32
  }
  func.func @transform_7(%arg0: i32) -> (i32, i32) {
    %c0_i32 = arith.constant 0 : i32
    %c0_i32_0 = arith.constant 0 : i32
    %c0_i32_1 = arith.constant 0 : i32
    return %c0_i32, %c0_i32_0 : i32, i32
  }
  func.func @transform_8(%arg0: i32) -> (i32, i32) {
    %c0_i32 = arith.constant 0 : i32
    %c0_i32_0 = arith.constant 0 : i32
    %c0_i32_1 = arith.constant 0 : i32
    return %c0_i32, %c0_i32_0 : i32, i32
  }
  func.func @transform_9(%arg0: i32) -> (i32, i32) {
    %c0_i32 = arith.constant 0 : i32
    %c0_i32_0 = arith.constant 0 : i32
    %c0_i32_1 = arith.constant 0 : i32
    return %c0_i32, %c0_i32_0 : i32, i32
  }
  func.func @transform_10(%arg0: i32) -> (i32, i32) {
    %c0_i32 = arith.constant 0 : i32
    %c0_i32_0 = arith.constant 0 : i32
    %c0_i32_1 = arith.constant 0 : i32
    return %c0_i32, %c0_i32_0 : i32, i32
  }
  func.func @transform_11(%arg0: i32) -> (i32, i32) {
    %c0_i32 = arith.constant 0 : i32
    %c0_i32_0 = arith.constant 0 : i32
    %c0_i32_1 = arith.constant 0 : i32
    return %c0_i32, %c0_i32_0 : i32, i32
  }
  func.func @transform_12(%arg0: i32) -> (i32, i32) {
    %c0_i32 = arith.constant 0 : i32
    %c0_i32_0 = arith.constant 0 : i32
    %c0_i32_1 = arith.constant 0 : i32
    return %c0_i32, %c0_i32_0 : i32, i32
  }
  func.func @transform_13(%arg0: i32) -> (i32, i32) {
    %c0_i32 = arith.constant 0 : i32
    %c0_i32_0 = arith.constant 0 : i32
    return %arg0, %c0_i32 : i32, i32
  }
}

</mosaic_0001>

<bundles_post_ra>
// kernel: lenet_forward.1
= control target key start
LH: loop header
LB: loop body
LE: loop exit
PB: predicated region body
PF: predicated region fallthrough
CT: control target
= control target key end

     0   :  { %vm46_vm0 = vcmask 228352   ;;  %v3009_v3 = vmov 0.0   ;;  %vm62_vm1 = vcmask 224256   ;;  %vm88_vm2 = vcmask 1046528   ;;  %s3010_s20 = smov 28   ;;  %s3011_s23 = smov 84   ;;  %s4020_s0 = inlined_call_operand.vmem [shape: f32[56,28], index: 0, kind: input, shape index: {}]   ;;  %s4021_s1 = inlined_call_operand.vmem [shape: bf16[140,168], index: 1, kind: input, shape index: {}]   ;;  %s4022_s2 = inlined_call_operand.vmem [shape: f32[1,168], index: 2, kind: input, shape index: {}]   ;;  %s4023_s3 = inlined_call_operand.vmem [shape: bf16[2,168,84], index: 3, kind: input, shape index: {}]   ;;  %s4024_s4 = inlined_call_operand.vmem [shape: bf16[420,160], index: 4, kind: input, shape index: {}]   ;;  %s4025_s5 = inlined_call_operand.vmem [shape: f32[1,160], index: 5, kind: input, shape index: {}]   ;;  %s4026_s6 = inlined_call_operand.vmem [shape: bf16[2,160,80], index: 6, kind: input, shape index: {}]   ;;  %s4027_s7 = inlined_call_operand.vmem [shape: bf16[400,120], index: 7, kind: input, shape index: {}]   ;;  %s4028_s8 = inlined_call_operand.vmem [shape: f32[1,120], index: 8, kind: input, shape index: {}]   ;;  %s4029_s9 = inlined_call_operand.vmem [shape: f32[120,84], index: 9, kind: input, shape index: {}]   ;;  %s4030_s10 = inlined_call_operand.vmem [shape: f32[1,84], index: 10, kind: input, shape index: {}]   ;;  %s4031_s11 = inlined_call_operand.vmem [shape: f32[84,10], index: 11, kind: input, shape index: {}]   ;;  %s4032_s12 = inlined_call_operand.vmem [shape: f32[1,10], index: 12, kind: input, shape index: {}]   ;;  %s4033_s13 = inlined_call_operand.hbm [shape: f32[2,10], index: 13, kind: output, shape index: {}]  }
   0x1   :  { %v55_v0 = vld [vmem:[%s4020_s0] sm:$0xff]  ;;  %v56_v1 = vld [vmem:[%s4020_s0 + $0x8] sm:$0xff]  ;;  %v57_v2 = vld [vmem:[%s4020_s0 + $0x10] sm:$0xff]  ;;  %47 = vst.msk [vmem:[#allocation2] sm:$0xff] %vm46_vm0, %v3009_v3  ;;  %vm168_vm3 = vcmask 1044480   ;;  %vm128_vm4 = vcmask 1045504  }
   0x2   :  { %48 = vst.msk [vmem:[#allocation2 + $0x8] sm:$0xff] %vm46_vm0, %v3009_v3  ;;  %49 = vst.msk [vmem:[#allocation2 + $0x10] sm:$0xff] %vm46_vm0, %v3009_v3  ;;  %v58_v4 = vld [vmem:[%s4020_s0 + $0x18] sm:$0xf]  ;;  %v64_v5 = vld [vmem:[%s4020_s0 + $0x1c] sm:$0xff]  ;;  %vm208_vm5 = vcmask 1043456  }
   0x3   :  { %50 = vst.msk [vmem:[#allocation2 + $0x18] sm:$0xff] %vm46_vm0, %v3009_v3  ;;  %51 = vst.msk [vmem:[#allocation2 + $0x20] sm:$0xff] %vm46_vm0, %v3009_v3  ;;  %v65_v6 = vld [vmem:[%s4020_s0 + $0x24] sm:$0xff]  ;;  %v66_v7 = vld [vmem:[%s4020_s0 + $0x2c] sm:$0xff]  ;;  %s3012_s26 = smov 56   ;;  %s3013_s29 = smov 112  }
   0x4   :  { %52 = vst.msk [vmem:[#allocation2 + $0x28] sm:$0xff] %vm46_vm0, %v3009_v3  ;;  %53 = vst.msk [vmem:[#allocation2 + $0x30] sm:$0xff] %vm46_vm0, %v3009_v3  ;;  %v67_v8 = vld [vmem:[%s4020_s0 + $0x34] sm:$0xf]  ;;  %v2811_v9 = vld [vmem:[%s4021_s1 + $0x4] ss:$8 sps:$4 sm:$0xff]  }
   0x5   :  { %54 = vst.msk [vmem:[#allocation2 + $0x38] sm:$0xff] %vm46_vm0, %v3009_v3  ;;  %59 = vst.msk [vmem:[#allocation2 + $0x2] sm:$0xff] %vm46_vm0, %v55_v0  ;;  %v2813_v10 = vld [vmem:[%s4021_s1] ss:$8 sps:$4 sm:$0xff]   ;;  %v2814_v11 = vld [vmem:[%s4021_s1 + $0x14] ss:$8 sps:$4 sm:$0xff]   ;;  %428 = vmatprep.subr.bf16.mxu0 %v2811_v9 }
   0x6   :  { %60 = vst.msk [vmem:[#allocation2 + $0xa] sm:$0xff] %vm46_vm0, %v56_v1  ;;  %61 = vst.msk [vmem:[#allocation2 + $0x12] sm:$0xff] %vm46_vm0, %v57_v2  ;;  %429 = vmatpush1.bf16.msra.mxu0 %v2813_v10  ;;  %v2816_v12 = vld [vmem:[%s4021_s1 + $0x10] ss:$8 sps:$4 sm:$0xff]   ;;  %v2817_v13 = vld [vmem:[%s4021_s1 + $0x24] ss:$8 sps:$4 sm:$0xff]  }
   0x7   :  { %63 = vst.msk [vmem:[#allocation2 + $0x1a] sm:$0xf] %vm62_vm1, %v58_v4  ;;  %71 = vst.msk [vmem:[#allocation2 + $0x3a] sm:$0xf] %vm62_vm1, %v67_v8  ;;  %430 = vmatprep.subr.bf16.mxu0 %v2814_v11  ;;  %v2819_v17 = vld [vmem:[%s4021_s1 + $0x20] ss:$8 sps:$4 sm:$0xff]  }
   0x8   :  { %68 = vst.msk [vmem:[#allocation2 + $0x22] sm:$0xff] %vm46_vm0, %v64_v5  ;;  %69 = vst.msk [vmem:[#allocation2 + $0x2a] sm:$0xff] %vm46_vm0, %v65_v6  ;;  %v2820_v22 = vld [vmem:[%s4021_s1 + $0x34] ss:$8 sps:$4 sm:$0xff]   ;;  %v2822_v45 = vld [vmem:[%s4021_s1 + $0x30] ss:$8 sps:$4 sm:$0xff]  }
   0x9   :  { %70 = vst.msk [vmem:[#allocation2 + $0x32] sm:$0xff] %vm46_vm0, %v66_v7  ;;  %v2823_v51 = vld [vmem:[%s4021_s1 + $0x44] ss:$8 sps:$4 sm:$0xff]   ;;  %v2825_v1 = vld [vmem:[%s4021_s1 + $0x40] ss:$8 sps:$4 sm:$0xff]  }
   0xa   :  { %431 = vmatpush1.bf16.msra.mxu0 %v2816_v12  ;;  %v2826_v8 = vld [vmem:[%s4021_s1 + $0x54] ss:$8 sps:$4 sm:$0xff]   ;;  %v2828_v12 = vld [vmem:[%s4021_s1 + $0x50] ss:$8 sps:$4 sm:$0xff]  }
   0xb   :  { %432 = vmatprep.subr.bf16.mxu0 %v2817_v13 }
   0xc   :  { %v3154_v14 = vld [vmem:[#allocation2] sm:$0xff] }
   0xd   :  { %v3156_v15 = vld [vmem:[#allocation2 + $0x8] sm:$0xff]  ;;  %v3158_v16 = vld [vmem:[#allocation2 + $0x10] sm:$0xff]  ;;  %v89_v18 = vrot.slane %v3154_v14, 1  ;;  %v169_v21 = vrot.slane %v3154_v14, 3  ;;  %v129_v25 = vrot.slane %v3154_v14, 2  ;;  %v209_v31 = vrot.slane %v3154_v14, 4 }
   0xe   :  { %v90_v19 = vrot.slane %v3156_v15, 1  ;;  %v92_v20 = vrot.slane %v3158_v16, 1  ;;  %v170_v23 = vrot.slane %v3156_v15, 3  ;;  %v172_v24 = vrot.slane %v3158_v16, 3  ;;  %v3174_v27 = vld [vmem:[#allocation2 + $0x18] sm:$0xff]  ;;  %433 = vmatpush1.bf16.msra.mxu0 %v2819_v17 }
   0xf   :  { %v130_v26 = vrot.slane %v3156_v15, 2  ;;  %v132_v30 = vrot.slane %v3158_v16, 2  ;;  %v3180_v32 = vld [vmem:[#allocation2 + $0x20] sm:$0xff]  ;;  %v210_v39 = vrot.slane %v3156_v15, 4  ;;  %v212_v40 = vrot.slane %v3158_v16, 4  ;;  %v3200_v50 = vld [vmem:[#allocation2 + $0x28] sm:$0xff]  ;;  %434 = vmatprep.subr.bf16.mxu0 %v2820_v22 }
  0x10   :  { %v91_v28 = vsel %vm88_vm2, %v89_v18, %v90_v19  ;;  %v93_v29 = vsel %vm88_vm2, %v90_v19, %v92_v20  ;;  %v171_v34 = vsel %vm168_vm3, %v169_v21, %v170_v23  ;;  %v173_v35 = vsel %vm168_vm3, %v170_v23, %v172_v24  ;;  %v3208_v56 = vld [vmem:[#allocation2 + $0x30] sm:$0xff]  ;;  %v3225_v7 = vld [vmem:[#allocation2 + $0x38] sm:$0xff]  ;;  %v2829_v19 = vld [vmem:[%s4021_s1 + $0x64] ss:$8 sps:$4 sm:$0xff]  }
  0x11   :  { %v2671_v33 = vpack.i.bf16 %v93_v29, %v91_v28  ;;  %v131_v36 = vsel %vm128_vm4, %v129_v25, %v130_v26  ;;  %v2681_v37 = vpack.i.bf16 %v173_v35, %v171_v34  ;;  %v133_v38 = vsel %vm128_vm4, %v130_v26, %v132_v30  ;;  %v2831_v29 = vld [vmem:[%s4021_s1 + $0x60] ss:$8 sps:$4 sm:$0xff]  }
  0x12   :  { %v2676_v41 = vpack.i.bf16 %v133_v38, %v131_v36  ;;  %v94_v42 = vrot.slane %v3174_v27, 1  ;;  %v96_v43 = vrot.slane %v3180_v32, 1  ;;  %v134_v44 = vrot.slane %v3174_v27, 2  ;;  %435 = vmatpush1.bf16.msra.mxu0 %v2822_v45 }
  0x13   :  { %2672 = vrot.lane.b32.xlu0 %v2671_v33, %s3010_s20  ;;  %2682 = vrot.lane.b32.xlu1 %v2681_v37, %s3011_s23  ;;  %v211_v46 = vsel %vm208_vm5, %v209_v31, %v210_v39  ;;  %v213_v47 = vsel %vm208_vm5, %v210_v39, %v212_v40  ;;  %v136_v48 = vrot.slane %v3180_v32, 2  ;;  %v174_v49 = vrot.slane %v3174_v27, 3  ;;  %v2832_v31 = vld [vmem:[%s4021_s1 + $0x74] ss:$8 sps:$4 sm:$0xff]  }
  0x14   :  { %v2686_v52 = vpack.i.bf16 %v213_v47, %v211_v46  ;;  %v95_v53 = vsel %vm88_vm2, %v92_v20, %v94_v42  ;;  %v97_v54 = vsel %vm88_vm2, %v94_v42, %v96_v43  ;;  %v135_v55 = vsel %vm128_vm4, %v132_v30, %v134_v44  ;;  %436 = vmatprep.subr.bf16.mxu0 %v2823_v51  ;;  %v2835_v42 = vld [vmem:[%s4021_s1 + $0x84] ss:$8 sps:$4 sm:$0x3f]  }
  0x15   :  { %v2691_v57 = vpack.i.bf16 %v97_v54, %v95_v53  ;;  %v137_v58 = vsel %vm128_vm4, %v134_v44, %v136_v48  ;;  %v175_v59 = vsel %vm168_vm3, %v172_v24, %v174_v49  ;;  %v176_v60 = vrot.slane %v3180_v32, 3  ;;  %v2838_v53 = vld [vmem:[%s4023_s3] sm:$0xff]  }
  0x16   :  { %v2696_v61 = vpack.i.bf16 %v137_v58, %v135_v55  ;;  %v214_v62 = vrot.slane %v3174_v27, 4  ;;  %v216_v63 = vrot.slane %v3180_v32, 4  ;;  %v98_v0 = vrot.slane %v3200_v50, 1  ;;  %437 = vmatpush1.bf16.msra.mxu0 %v2825_v1 }
  0x17   :  { %2677 = vrot.lane.b32.xlu0 %v2676_v41, %s3012_s26  ;;  %2687 = vrot.lane.b32.xlu1 %v2686_v52, %s3013_s29  ;;  %v177_v2 = vsel %vm168_vm3, %v174_v49, %v176_v60  ;;  %v100_v4 = vrot.slane %v3208_v56, 1  ;;  %v138_v5 = vrot.slane %v3200_v50, 2  ;;  %v140_v6 = vrot.slane %v3208_v56, 2 }
  0x18   :  { %v215_v9 = vsel %vm208_vm5, %v212_v40, %v214_v62  ;;  %v217_v10 = vsel %vm208_vm5, %v214_v62, %v216_v63  ;;  %v2701_v11 = vpack.i.bf16 %v177_v2, %v175_v59  ;;  %v99_v17 = vsel %vm88_vm2, %v96_v43, %v98_v0  ;;  %438 = vmatprep.subr.bf16.mxu0 %v2826_v8  ;;  %v2834_v40 = vld [vmem:[%s4021_s1 + $0x70] ss:$8 sps:$4 sm:$0xff]   ;;  %v2837_v43 = vld [vmem:[%s4021_s1 + $0x80] ss:$8 sps:$4 sm:$0x3f]  }
  0x19   :  { %v2706_v13 = vpack.i.bf16 %v217_v10, %v215_v9  ;;  %v101_v18 = vsel %vm88_vm2, %v98_v0, %v100_v4  ;;  %v178_v20 = vrot.slane %v3200_v50, 3  ;;  %v180_v21 = vrot.slane %v3208_v56, 3  ;;  %v2842_v59 = vld [vmem:[%s4023_s3 + $0x10] sm:$0xff]   ;;  %v2848_v62 = vld [vmem:[%s4023_s3 + $0x28] sm:$0xff]   ;;  %v2852_v0 = vld [vmem:[%s4023_s3 + $0x38] sm:$0xff]  }
  0x1a   :  { %v218_v22 = vrot.slane %v3200_v50, 4  ;;  %v220_v23 = vrot.slane %v3208_v56, 4  ;;  %v139_v24 = vsel %vm128_vm4, %v136_v48, %v138_v5  ;;  %v141_v25 = vsel %vm128_vm4, %v138_v5, %v140_v6  ;;  %439 = vmatpush1.bf16.msra.mxu0 %v2828_v12 }
  0x1b   :  { %2692 = vrot.lane.b32.xlu0 %v2691_v57, %s3010_s20  ;;  %2697 = vrot.lane.b32.xlu1 %v2696_v61, %s3012_s26  ;;  %v102_v26 = vrot.slane %v3225_v7, 1  ;;  %v142_v28 = vrot.slane %v3225_v7, 2  ;;  %v2711_v30 = vpack.i.bf16 %v101_v18, %v99_v17  ;;  %v2716_v33 = vpack.i.bf16 %v141_v25, %v139_v24  ;;  %v2840_v57 = vld [vmem:[%s4023_s3 + $0x8] sm:$0xff]   ;;  %v2846_v61 = vld [vmem:[%s4023_s3 + $0x20] sm:$0xff]  }
  0x1c   :  { %v179_v34 = vsel %vm168_vm3, %v176_v60, %v178_v20  ;;  %v181_v35 = vsel %vm168_vm3, %v178_v20, %v180_v21  ;;  %v182_v36 = vrot.slane %v3225_v7, 3  ;;  %v219_v37 = vsel %vm208_vm5, %v216_v63, %v218_v22  ;;  %440 = vmatprep.subr.bf16.mxu0 %v2829_v19  ;;  %v2844_v60 = vld [vmem:[%s4023_s3 + $0x18] sm:$0xff]   ;;  %v2850_v63 = vld [vmem:[%s4023_s3 + $0x30] sm:$0xff]  }
  0x1d   :  { %v221_v38 = vsel %vm208_vm5, %v218_v22, %v220_v23  ;;  %v222_v39 = vrot.slane %v3225_v7, 4  ;;  %v2721_v41 = vpack.i.bf16 %v181_v35, %v179_v34  ;;  %v103_v45 = vsel %vm88_vm2, %v100_v4, %v102_v26 }
  0x1e   :  { %v2726_v44 = vpack.i.bf16 %v221_v38, %v219_v37  ;;  %441 = vmatpush1.bf16.msra.mxu0 %v2831_v29  ;;  %v143_v46 = vsel %vm128_vm4, %v140_v6, %v142_v28  ;;  %v2731_v47 = vpack.i.bf16 %v102_v26, %v103_v45  ;;  %v183_v49 = vsel %vm168_vm3, %v180_v21, %v182_v36 }
  0x1f   :  { %2702 = vrot.lane.b32.xlu0 %v2701_v11, %s3011_s23  ;;  %2707 = vrot.lane.b32.xlu1 %v2706_v13, %s3013_s29  ;;  %v2736_v48 = vpack.i.bf16 %v142_v28, %v143_v46  ;;  %v223_v51 = vsel %vm208_vm5, %v220_v23, %v222_v39  ;;  %v423_v52 = vsel %vm128_vm4, %v2837_v43, 0  ;;  %v3014_v54 = vmov 0  }
  0x20   :  { %442 = vmatprep.subr.bf16.mxu0 %v2832_v31  ;;  %625 = vmatprep.subr.bf16.mxu1 %v3014_v54  ;;  %v2741_v55 = vpack.i.bf16 %v182_v36, %v183_v49  ;;  %v2746_v58 = vpack.i.bf16 %v222_v39, %v223_v51 }
  0x21   :  { %626 = vmatpush1.bf16.msra.mxu1 %v2838_v53 }
  0x22   :  { %443 = vmatpush1.bf16.msra.mxu0 %v2834_v40  ;;  %627 = vmatprep.subr.bf16.mxu1 %v3014_v54 }
  0x23   :  { %2712 = vrot.lane.b32.xlu0 %v2711_v30, %s3010_s20  ;;  %2717 = vrot.lane.b32.xlu1 %v2716_v33, %s3012_s26 }
  0x24   :  { %2308 = vmatprep.subr.msk.bf16.mxu0 %vm128_vm4, %v2835_v42 }
  0x25   :  { %628 = vmatpush1.bf16.msra.mxu1 %v2840_v57 }
  0x26   :  { %445 = vmatpush1.bf16.msra.mxu0 %v423_v52  ;;  %629 = vmatprep.subr.bf16.mxu1 %v3014_v54 }
  0x27   :  { %2722 = vrot.lane.b32.xlu0 %v2721_v41, %s3011_s23  ;;  %2727 = vrot.lane.b32.xlu1 %v2726_v44, %s3013_s29 }
  0x28   :  { %778 = vmatprep.subr.bf16.mxu0 %v3014_v54 }
  0x29   :  { %630 = vmatpush1.bf16.msra.mxu1 %v2842_v59 }
  0x2a   :  { %631 = vmatprep.subr.bf16.mxu1 %v3014_v54 }
  0x2b   :  { %2732 = vrot.lane.b32.xlu0 %v2731_v47, %s3010_s20  ;;  %2737 = vrot.lane.b32.xlu1 %v2736_v48, %s3012_s26 }
  0x2d   :  { %632 = vmatpush1.bf16.msra.mxu1 %v2844_v60 }
  0x2e   :  { %633 = vmatprep.subr.bf16.mxu1 %v3014_v54 }
  0x2f   :  { %2742 = vrot.lane.b32.xlu0 %v2741_v55, %s3011_s23  ;;  %2747 = vrot.lane.b32.xlu1 %v2746_v58, %s3013_s29 }
  0x31   :  { %634 = vmatpush1.bf16.msra.mxu1 %v2846_v61 }
  0x32   :  { %635 = vmatprep.subr.bf16.mxu1 %v3014_v54 }
  0x35   :  { %636 = vmatpush1.bf16.msra.mxu1 %v2848_v62 }
  0x36   :  { %637 = vmatprep.subr.bf16.mxu1 %v3014_v54 }
  0x39   :  { %638 = vmatpush1.bf16.msra.mxu1 %v2850_v63 }
  0x3a   :  { %639 = vmatprep.subr.bf16.mxu1 %v3014_v54 }
  0x3d   :  { %640 = vmatpush1.bf16.msra.mxu1 %v2852_v0 }
  0x3e   :  { %641 = vmatprep.subr.bf16.mxu1 %v3014_v54 }
  0x3f   :  { %18 = vsyncpa [#allocation7], 0  ;;  %vm256_vm6 = vcmask 457728   ;;  %vm265_vm7 = vcmask 687104   ;;  %vm274_vm8 = vcmask 916480   ;;  %vm409_vm9 = vcmask 97280  }
  0x40   :  { %v2839_v30 = vld [vmem:[%s4023_s3 + $0x54] sm:$0xff]   ;;  %v2841_v43 = vld [vmem:[%s4023_s3 + $0x5c] sm:$0xff]   ;;  %v2843_v57 = vld [vmem:[%s4023_s3 + $0x64] sm:$0xff]   ;;  %vm609_vm10 = vcmask 326656   ;;  %vm858_vm11 = vcmask 683008   ;;  %s3015_s15 = smov 40  }
  0x41   :  { %860 = vst.msk [vmem:[#allocation3 + $0x3c] sm:$0xf] %vm858_vm11, %v3009_v3  ;;  %s3016_s16 = smov 124   ;;  %s3017_s17 = smov 80   ;;  %vm968_vm12 = vcmask 1014784   ;;  %vm1316_vm13 = vcmask 293888  }
  0x42   :  { %vm1323_vm14 = vcmask 1041408   ;;  %vm973_vm15 = vcmask 654336   ;;  %vm1721_vm1 = vcmask 650240   ;;  %s3020_s24 = smov 64   ;;  %s3022_s28 = smov [#allocation6]  }
  0x43   :  { %1723 = vst.msk [vmem:[#allocation4 + $0x1c] sm:$0xf] %vm1721_vm1, %v3009_v3  ;;  %s2282_s30 = sshll.u32 %s3022_s28, 4  ;;  %s2283_s30 = int_to_ptr.vmem [resolvable:$true] %s2282_s30 }
  0x44   :  { %p2990_p1 = scmp.lt.s32.totalorder %s2283_s30, %s2283_s30 }
  0x85   :  { %v2673_v1 = vpop.permute.xlu0 %2672  ;;  %v2683_v2 = vpop.permute.xlu1 %2682 }
  0x86   :  { %v2675_v4 = vunpack.i.h.bf16 %v2673_v1  ;;  %v2674_v5 = vunpack.i.l.bf16 %v2673_v1  ;;  %v2685_v8 = vunpack.i.h.bf16 %v2683_v2  ;;  %v2684_v9 = vunpack.i.l.bf16 %v2683_v2 }
  0x88   :  { %v249_v13 = vsel %vm46_vm0, %v3156_v15, %v2675_v4  ;;  %v248_v17 = vsel %vm46_vm0, %v3154_v14, %v2674_v5  ;;  %v2845_v5 = vld [vmem:[%s4023_s3 + $0x6c] sm:$0xff]  }
  0x89   :  { %v2678_v6 = vpop.permute.xlu0 %2677  ;;  %v2688_v12 = vpop.permute.xlu1 %2687 }
  0x8a   :  { %v2680_v10 = vunpack.i.h.bf16 %v2678_v6  ;;  %v2679_v11 = vunpack.i.l.bf16 %v2678_v6  ;;  %v2690_v18 = vunpack.i.h.bf16 %v2688_v12  ;;  %v2689_v19 = vunpack.i.l.bf16 %v2688_v12 }
  0x8c   :  { %v257_v20 = vsel %vm256_vm6, %v248_v17, %v2679_v11  ;;  %v258_v21 = vsel %vm256_vm6, %v249_v13, %v2680_v10  ;;  %v284_v23 = vpack.c.bf16 %v2690_v18, %v2689_v19 }
  0x8d   :  { %v2693_v22 = vpop.permute.xlu0 %2692  ;;  %v266_v24 = vsel %vm265_vm7, %v257_v20, %v2684_v9  ;;  %v267_v25 = vsel %vm265_vm7, %v258_v21, %v2685_v8  ;;  %v2698_v29 = vpop.permute.xlu1 %2697  ;;  %v2847_v20 = vld [vmem:[%s4023_s3 + $0x74] sm:$0xff]  }
  0x8e   :  { %v2695_v26 = vunpack.i.h.bf16 %v2693_v22  ;;  %v2694_v28 = vunpack.i.l.bf16 %v2693_v22  ;;  %v275_v15 = vsel %vm274_vm8, %v266_v24, %v2689_v19  ;;  %v276_v14 = vsel %vm274_vm8, %v267_v25, %v2690_v18  ;;  %2309 = vmatprep.mubr.msk.bf16.mxu0 %vm409_vm9, %v284_v23 }
  0x8f   :  { %v2700_v31 = vunpack.i.h.bf16 %v2698_v29  ;;  %v2699_v33 = vunpack.i.l.bf16 %v2698_v29  ;;  %v283_v34 = vpack.c.bf16 %v276_v14, %v275_v15 }
  0x90   :  { %v251_v35 = vsel %vm46_vm0, %v3174_v27, %v2695_v26  ;;  %v250_v36 = vsel %vm46_vm0, %v3158_v16, %v2694_v28 }
  0x91   :  { %v259_v37 = vsel %vm256_vm6, %v250_v36, %v2699_v33  ;;  %v260_v38 = vsel %vm256_vm6, %v251_v35, %v2700_v31  ;;  %v2703_v39 = vpop.permute.xlu0 %2702  ;;  %461 = vmatmul.mubr.bf16.vlgmr.msra.gmra.mrb[0].mxu0 %v283_v34  ;;  %v2708_v42 = vpop.permute.xlu1 %2707 }
  0x92   :  { %v2705_v40 = vunpack.i.h.bf16 %v2703_v39  ;;  %v2704_v41 = vunpack.i.l.bf16 %v2703_v39  ;;  %779 = vmatpush1.bf16.msra.mxu0 %v2839_v30  ;;  %v2710_v44 = vunpack.i.h.bf16 %v2708_v42  ;;  %v2709_v45 = vunpack.i.l.bf16 %v2708_v42  ;;  %v2849_v30 = vld [vmem:[%s4023_s3 + $0x7c] sm:$0xff]   ;;  %v2853_v39 = vld [vmem:[%s4023_s3 + $0x8c] sm:$0xff]  }
  0x93   :  { %780 = vmatprep.subr.bf16.mxu0 %v3014_v54  ;;  %v2856_v42 = vld [vmem:[%s4023_s3 + $0x48] sm:$0xff]  }
  0x94   :  { %v268_v16 = vsel %vm265_vm7, %v259_v37, %v2704_v41  ;;  %v269_v27 = vsel %vm265_vm7, %v260_v38, %v2705_v40  ;;  %v286_v46 = vpack.c.bf16 %v2710_v44, %v2709_v45  ;;  %v2851_v38 = vld [vmem:[%s4023_s3 + $0x84] sm:$0xff]   ;;  %v2855_v41 = vld [vmem:[%s4023_s3 + $0x94] sm:$0xff]  }
  0x95   :  { %v2713_v47 = vpop.permute.xlu0 %2712  ;;  %v277_v48 = vsel %vm274_vm8, %v268_v16, %v2709_v45  ;;  %v278_v49 = vsel %vm274_vm8, %v269_v27, %v2710_v44  ;;  %v2718_v53 = vpop.permute.xlu1 %2717  ;;  %v2854_v40 = vld [vmem:[%s4023_s3 + $0x40] sm:$0xff]   ;;  %v2858_v44 = vld [vmem:[%s4023_s3 + $0x50] ss:$0 sps:$4 sm:$0xff]  }
  0x96   :  { %v2715_v51 = vunpack.i.h.bf16 %v2713_v47  ;;  %v2714_v52 = vunpack.i.l.bf16 %v2713_v47  ;;  %v285_v55 = vpack.c.bf16 %v278_v49, %v277_v48  ;;  %781 = vmatpush1.bf16.msra.mxu0 %v2841_v43  ;;  %v2720_v58 = vunpack.i.h.bf16 %v2718_v53  ;;  %2310 = vmatprep.mubr.msk.bf16.mxu0 %vm409_vm9, %v286_v46  ;;  %v2857_v43 = vld [vmem:[%s4023_s3 + $0x9c] sm:$0xff]   ;;  %v2859_v45 = vld [vmem:[%s4023_s3 + $0xa4] ss:$0 sps:$4 sm:$0xff]  }
  0x97   :  { %v2719_v59 = vunpack.i.l.bf16 %v2718_v53  ;;  %782 = vmatprep.subr.bf16.mxu0 %v3014_v54  ;;  %642 = vmatpush1.bf16.msra.mxu1 %v2854_v40  ;;  %v623_v16 = vsel %vm208_vm5, %v2858_v44, 0  ;;  %v776_v27 = vsel %vm208_vm5, %v2859_v45, 0  ;;  %v311_v46 = vlaneseq  ;;  %v309_v49 = vld [vmem:[%s4022_s2] sm:$0x3] }
  0x98   :  { %v253_v60 = vsel %vm46_vm0, %v3200_v50, %v2715_v51  ;;  %v252_v61 = vsel %vm46_vm0, %v3180_v32, %v2714_v52  ;;  %643 = vmatprep.subr.bf16.mxu1 %v3014_v54 }
  0x99   :  { %v261_v62 = vsel %vm256_vm6, %v252_v61, %v2719_v59  ;;  %v262_v63 = vsel %vm256_vm6, %v253_v60, %v2720_v58  ;;  %v2723_v0 = vpop.permute.xlu0 %2722  ;;  %471 = vmatmul.mubr.bf16.gmra.mrb[4].mxu0 %v285_v55  ;;  %v2728_v4 = vpop.permute.xlu1 %2727  ;;  %v3422_v47 = vshrl.u32 %v311_v46, 7 }
  0x9a   :  { %v2725_v1 = vunpack.i.h.bf16 %v2723_v0  ;;  %v2724_v2 = vunpack.i.l.bf16 %v2723_v0  ;;  %783 = vmatpush1.bf16.msra.mxu0 %v2843_v57  ;;  %v2730_v6 = vunpack.i.h.bf16 %v2728_v4  ;;  %v2729_v8 = vunpack.i.l.bf16 %v2728_v4 }
  0x9b   :  { %784 = vmatprep.subr.bf16.mxu0 %v3014_v54  ;;  %644 = vmatpush1.bf16.msra.mxu1 %v2856_v42  ;;  %v313_v48 = vsub.s32 0, %v3422_v47  ;;  %v317_v51 = vsub.s32 1, %v3422_v47  ;;  %v2950_v47 = vld [vmem:[%s4026_s6 + $0x50] sm:$0xff]  }
  0x9c   :  { %v270_v32 = vsel %vm265_vm7, %v261_v62, %v2724_v2  ;;  %v271_v50 = vsel %vm265_vm7, %v262_v63, %v2725_v1  ;;  %v288_v9 = vpack.c.bf16 %v2730_v6, %v2729_v8  ;;  %645 = vmatprep.subr.bf16.mxu1 %v3014_v54 }
  0x9d   :  { %v2733_v10 = vpop.permute.xlu0 %2732  ;;  %v279_v11 = vsel %vm274_vm8, %v270_v32, %v2729_v8  ;;  %v280_v12 = vsel %vm274_vm8, %v271_v50, %v2730_v6  ;;  %v2738_v18 = vpop.permute.xlu1 %2737  ;;  %v314_v52 = vrot.slane %v309_v49, %v313_v48  ;;  %v3433_v53 = vrot.slane %v309_v49, %v317_v51  ;;  %v2860_v49 = vld [vmem:[%s4024_s4] ss:$8 sps:$4 sm:$0xff]  }
  0x9e   :  { %v2735_v13 = vunpack.i.h.bf16 %v2733_v10  ;;  %v2734_v17 = vunpack.i.l.bf16 %v2733_v10  ;;  %v287_v19 = vpack.c.bf16 %v280_v12, %v279_v11  ;;  %785 = vmatpush1.bf16.msra.mxu0 %v2845_v5  ;;  %v2740_v21 = vunpack.i.h.bf16 %v2738_v18  ;;  %2311 = vmatprep.mubr.msk.bf16.mxu0 %vm409_vm9, %v288_v9 }
  0x9f   :  { %v2739_v22 = vunpack.i.l.bf16 %v2738_v18  ;;  %786 = vmatprep.subr.bf16.mxu0 %v3014_v54  ;;  %646 = vmatpush1.bf16.msra.mxu1 %v623_v16 }
  0xa0   :  { %v255_v23 = vsel %vm46_vm0, %v3225_v7, %v2735_v13  ;;  %v254_v24 = vsel %vm46_vm0, %v3208_v56, %v2734_v17  ;;  %vm1528_vm0 = vcmask 261120  }
  0xa1   :  { %v263_v25 = vsel %vm256_vm6, %v254_v24, %v2739_v22  ;;  %v264_v26 = vsel %vm256_vm6, %v255_v23, %v2740_v21  ;;  %481 = vmatmul.mubr.bf16.gmra.mrb[8].mxu0 %v287_v19  ;;  %v2743_v28 = vpop.permute.xlu0 %2742  ;;  %v2748_v14 = vpop.permute.xlu1 %2747  ;;  %vm2079_vm6 = vcmask 982016  }
  0xa2   :  { %v2745_v29 = vunpack.i.h.bf16 %v2743_v28  ;;  %v2744_v15 = vunpack.i.l.bf16 %v2743_v28  ;;  %787 = vmatpush1.bf16.msra.mxu0 %v2847_v20  ;;  %v2750_v31 = vunpack.i.h.bf16 %v2748_v14  ;;  %v2749_v33 = vunpack.i.l.bf16 %v2748_v14 }
  0xa3   :  { %788 = vmatprep.subr.bf16.mxu0 %v3014_v54 }
  0xa4   :  { %v272_v56 = vsel %vm265_vm7, %v263_v25, %v2744_v15  ;;  %v273_v7 = vsel %vm265_vm7, %v264_v26, %v2745_v29  ;;  %v290_v34 = vpack.c.bf16 %v2750_v31, %v2749_v33 }
  0xa5   :  { %v281_v35 = vsel %vm274_vm8, %v272_v56, %v2749_v33  ;;  %v282_v36 = vsel %vm274_vm8, %v273_v7, %v2750_v31 }
  0xa6   :  { %v289_v37 = vpack.c.bf16 %v282_v36, %v281_v35  ;;  %789 = vmatpush1.bf16.msra.mxu0 %v2849_v30  ;;  %2312 = vmatprep.mubr.msk.bf16.mxu0 %vm409_vm9, %v290_v34  ;;  %vm2274_vm9 = vcmask 74752  }
  0xa7   :  { %790 = vmatprep.subr.bf16.mxu0 %v3014_v54 }
  0xa9   :  { %491 = vmatmul.mubr.bf16.gmra.mrb[12].mxu0 %v289_v37 }
  0xaa   :  { %791 = vmatpush1.bf16.msra.mxu0 %v2851_v38 }
  0xab   :  { %792 = vmatprep.subr.bf16.mxu0 %v3014_v54 }
  0xae   :  { %793 = vmatpush1.bf16.msra.mxu0 %v2853_v39 }
  0xaf   :  { %794 = vmatprep.subr.bf16.mxu0 %v3014_v54 }
  0xb2   :  { %795 = vmatpush1.bf16.msra.mxu0 %v2855_v41 }
  0xb3   :  { %796 = vmatprep.subr.bf16.mxu0 %v3014_v54 }
  0xb6   :  { %797 = vmatpush1.bf16.msra.mxu0 %v2857_v43 }
  0xb7   :  { %798 = vmatprep.subr.bf16.mxu0 %v3014_v54 }
  0xba   :  { %799 = vmatpush1.bf16.msra.mxu0 %v776_v27 }
  0xbb   :  { %1535 = vmatprep.subr.bf16.mxu0 %v3014_v54 }
 0x164   :  { %v462_v55 = vpop.f32.mrb[0].mxu0 }
 0x165   :  { %v463_v57 = vadd.f32 %v462_v55, %v314_v52  ;;  %v464_v58 = vpop.f32.mrb[1].mxu0  ;;  %v2863_v55 = vld [vmem:[%s4024_s4 + $0x10] ss:$8 sps:$4 sm:$0xff]  }
 0x166   :  { %v465_v59 = vadd.f32 %v464_v58, %v3433_v53  ;;  %v466_v60 = vpop.f32.mrb[2].mxu0  ;;  %v2866_v58 = vld [vmem:[%s4024_s4 + $0x20] ss:$8 sps:$4 sm:$0xff]  }
 0x167   :  { %v467_v61 = vadd.f32 %v466_v60, %v314_v52  ;;  %v468_v62 = vpop.f32.mrb[3].mxu0  ;;  %v501_v0 = vmax.f32 %v463_v57, 0.0  ;;  %v2868_v57 = vld [vmem:[%s4024_s4 + $0x24] ss:$8 sps:$4 sm:$0xff]   ;;  %v2869_v60 = vld [vmem:[%s4024_s4 + $0x30] ss:$8 sps:$4 sm:$0xff]  }
 0x168   :  { %v469_v63 = vadd.f32 %v468_v62, %v3433_v53  ;;  %v502_v2 = vmax.f32 %v465_v59, 0.0  ;;  %v2871_v59 = vld [vmem:[%s4024_s4 + $0x34] ss:$8 sps:$4 sm:$0xff]   ;;  %v2872_v62 = vld [vmem:[%s4024_s4 + $0x40] ss:$8 sps:$4 sm:$0xff]  }
 0x169   :  { %v503_v1 = vmax.f32 %v467_v61, 0.0  ;;  %v2874_v61 = vld [vmem:[%s4024_s4 + $0x44] ss:$8 sps:$4 sm:$0xff]  }
 0x16a   :  { %v504_v4 = vmax.f32 %v469_v63, 0.0  ;;  %v2877_v63 = vld [vmem:[%s4024_s4 + $0x54] ss:$8 sps:$4 sm:$0xff]  }
 0x16b   :  { %v517_v5 = vpack.c.bf16 %v503_v1, %v501_v0  ;;  %v2875_v0 = vld [vmem:[%s4024_s4 + $0x50] ss:$8 sps:$4 sm:$0xff]   ;;  %v2880_v1 = vld [vmem:[%s4024_s4 + $0x64] ss:$8 sps:$4 sm:$0xff]  }
 0x16c   :  { %v472_v6 = vpop.f32.mrb[4].mxu0  ;;  %v518_v8 = vpack.c.bf16 %v504_v4, %v502_v2  ;;  %v2878_v2 = vld [vmem:[%s4024_s4 + $0x60] ss:$8 sps:$4 sm:$0xff]   ;;  %v2883_v4 = vld [vmem:[%s4024_s4 + $0x74] ss:$8 sps:$4 sm:$0xff]  }
 0x16d   :  { %v473_v32 = vadd.f32 %v472_v6, %v314_v52  ;;  %v474_v50 = vpop.f32.mrb[5].mxu0  ;;  %v2886_v6 = vld [vmem:[%s4024_s4 + $0x84] ss:$8 sps:$4 sm:$0xff]  }
 0x16e   :  { %v475_v9 = vadd.f32 %v474_v50, %v3433_v53  ;;  %v476_v10 = vpop.f32.mrb[6].mxu0  ;;  %2324 = vmatprep.mubr.msk.bf16.mxu1 %vm609_vm10, %v518_v8  ;;  %2360 = vmatprep.mubr.msk.bf16.mxu0 %vm609_vm10, %v518_v8  ;;  %v2884_v8 = vld [vmem:[%s4024_s4 + $0x80] ss:$8 sps:$4 sm:$0xff]   ;;  %v2887_v50 = vld [vmem:[%s4024_s4 + $0x90] ss:$8 sps:$4 sm:$0xff]  }
 0x16f   :  { %v477_v11 = vadd.f32 %v476_v10, %v314_v52  ;;  %v478_v12 = vpop.f32.mrb[7].mxu0  ;;  %658 = vmatmul.mubr.bf16.vlgmr.msra.gmra.mrb[0].mxu1 %v517_v5  ;;  %811 = vmatmul.mubr.bf16.vlgmr.msra.gmra.mrb[16].mxu0 %v517_v5  ;;  %v505_v17 = vmax.f32 %v473_v32, 0.0  ;;  %v2881_v5 = vld [vmem:[%s4024_s4 + $0x70] ss:$8 sps:$4 sm:$0xff]   ;;  %v2889_v32 = vld [vmem:[%s4024_s4 + $0x94] ss:$8 sps:$4 sm:$0xff]  }
 0x170   :  { %v479_v13 = vadd.f32 %v478_v12, %v3433_v53  ;;  %v506_v19 = vmax.f32 %v475_v9, 0.0  ;;  %v2892_v9 = vld [vmem:[%s4024_s4 + $0xa4] ss:$8 sps:$4 sm:$0xff]   ;;  %v2890_v10 = vld [vmem:[%s4024_s4 + $0xa0] ss:$8 sps:$4 sm:$0xff]  }
 0x171   :  { %v507_v18 = vmax.f32 %v477_v11, 0.0  ;;  %v2895_v11 = vld [vmem:[%s4024_s4 + $0xb4] ss:$8 sps:$4 sm:$0xff]   ;;  %v2893_v12 = vld [vmem:[%s4024_s4 + $0xb0] ss:$8 sps:$4 sm:$0xff]  }
 0x172   :  { %v508_v20 = vmax.f32 %v479_v13, 0.0  ;;  %v2898_v13 = vld [vmem:[%s4024_s4 + $0xc4] ss:$8 sps:$4 sm:$0xff]  }
 0x173   :  { %v519_v21 = vpack.c.bf16 %v507_v18, %v505_v17  ;;  %v2896_v17 = vld [vmem:[%s4024_s4 + $0xc0] ss:$8 sps:$4 sm:$0xff]   ;;  %v2901_v18 = vld [vmem:[%s4024_s4 + $0xd4] ss:$8 sps:$4 sm:$0xff]  }
 0x174   :  { %v520_v22 = vpack.c.bf16 %v508_v20, %v506_v19  ;;  %v482_v23 = vpop.f32.mrb[8].mxu0  ;;  %v2899_v19 = vld [vmem:[%s4024_s4 + $0xd0] ss:$8 sps:$4 sm:$0xff]  }
 0x175   :  { %v483_v24 = vadd.f32 %v482_v23, %v314_v52  ;;  %v484_v25 = vpop.f32.mrb[9].mxu0 }
 0x176   :  { %v485_v26 = vadd.f32 %v484_v25, %v3433_v53  ;;  %v486_v28 = vpop.f32.mrb[10].mxu0  ;;  %2325 = vmatprep.mubr.msk.bf16.mxu1 %vm609_vm10, %v520_v22  ;;  %2361 = vmatprep.mubr.msk.bf16.mxu0 %vm609_vm10, %v520_v22 }
 0x177   :  { %v487_v29 = vadd.f32 %v486_v28, %v314_v52  ;;  %v488_v15 = vpop.f32.mrb[11].mxu0  ;;  %666 = vmatmul.mubr.bf16.gmra.mrb[4].mxu1 %v519_v21  ;;  %819 = vmatmul.mubr.bf16.gmra.mrb[20].mxu0 %v519_v21  ;;  %v509_v30 = vmax.f32 %v483_v24, 0.0 }
 0x178   :  { %v489_v14 = vadd.f32 %v488_v15, %v3433_v53  ;;  %v510_v33 = vmax.f32 %v485_v26, 0.0 }
 0x179   :  { %v511_v31 = vmax.f32 %v487_v29, 0.0 }
 0x17a   :  { %v512_v56 = vmax.f32 %v489_v14, 0.0 }
 0x17b   :  { %v521_v7 = vpack.c.bf16 %v511_v31, %v509_v30 }
 0x17c   :  { %v522_v34 = vpack.c.bf16 %v512_v56, %v510_v33  ;;  %v492_v35 = vpop.f32.mrb[12].mxu0 }
 0x17d   :  { %v493_v36 = vadd.f32 %v492_v35, %v314_v52  ;;  %v494_v37 = vpop.f32.mrb[13].mxu0 }
 0x17e   :  { %v495_v38 = vadd.f32 %v494_v37, %v3433_v53  ;;  %v496_v39 = vpop.f32.mrb[14].mxu0  ;;  %2326 = vmatprep.mubr.msk.bf16.mxu1 %vm609_vm10, %v522_v34  ;;  %2362 = vmatprep.mubr.msk.bf16.mxu0 %vm609_vm10, %v522_v34 }
 0x17f   :  { %v513_v40 = vmax.f32 %v493_v36, 0.0  ;;  %v497_v41 = vadd.f32 %v496_v39, %v314_v52  ;;  %v498_v42 = vpop.f32.mrb[15].mxu0  ;;  %674 = vmatmul.mubr.bf16.gmra.mrb[8].mxu1 %v521_v7  ;;  %827 = vmatmul.mubr.bf16.gmra.mrb[24].mxu0 %v521_v7  ;;  %v2862_v52 = vld [vmem:[%s4024_s4 + $0x4] ss:$8 sps:$4 sm:$0xff]  }
 0x180   :  { %v514_v43 = vmax.f32 %v495_v38, 0.0  ;;  %v499_v44 = vadd.f32 %v498_v42, %v3433_v53  ;;  %v2865_v53 = vld [vmem:[%s4024_s4 + $0x14] ss:$8 sps:$4 sm:$0xff]   ;;  %1330 = vmatprep.subr.bf16.mxu1 %v2862_v52 }
 0x181   :  { %v515_v45 = vmax.f32 %v497_v41, 0.0  ;;  %1331 = vmatpush1.bf16.msra.mxu1 %v2860_v49 }
 0x182   :  { %v516_v16 = vmax.f32 %v499_v44, 0.0  ;;  %1332 = vmatprep.subr.bf16.mxu1 %v2865_v53 }
 0x183   :  { %v523_v27 = vpack.c.bf16 %v515_v45, %v513_v40 }
 0x184   :  { %v524_v46 = vpack.c.bf16 %v516_v16, %v514_v43 }
 0x185   :  { %1333 = vmatpush1.bf16.msra.mxu1 %v2863_v55  ;;  %v2904_v55 = vld [vmem:[%s4024_s4 + $0xe4] ss:$8 sps:$4 sm:$0xff]  }
 0x186   :  { %2327 = vmatprep.mubr.msk.bf16.mxu1 %vm609_vm10, %v524_v46  ;;  %2363 = vmatprep.mubr.msk.bf16.mxu0 %vm609_vm10, %v524_v46 }
 0x187   :  { %682 = vmatmul.mubr.bf16.gmra.mrb[12].mxu1 %v523_v27  ;;  %835 = vmatmul.mubr.bf16.gmra.mrb[28].mxu0 %v523_v27 }
 0x188   :  { %1334 = vmatprep.subr.bf16.mxu1 %v2868_v57 }
 0x189   :  { %1335 = vmatpush1.bf16.msra.mxu1 %v2866_v58 }
 0x18a   :  { %1336 = vmatprep.subr.bf16.mxu1 %v2871_v59  ;;  %v2902_v59 = vld [vmem:[%s4024_s4 + $0xe0] ss:$8 sps:$4 sm:$0xff]  }
 0x18d   :  { %1337 = vmatpush1.bf16.msra.mxu1 %v2869_v60 }
 0x18e   :  { %1338 = vmatprep.subr.bf16.mxu1 %v2874_v61 }
 0x191   :  { %1339 = vmatpush1.bf16.msra.mxu1 %v2872_v62 }
 0x192   :  { %1340 = vmatprep.subr.bf16.mxu1 %v2877_v63 }
 0x195   :  { %1341 = vmatpush1.bf16.msra.mxu1 %v2875_v0 }
 0x196   :  { %1342 = vmatprep.subr.bf16.mxu1 %v2880_v1 }
 0x199   :  { %1343 = vmatpush1.bf16.msra.mxu1 %v2878_v2 }
 0x19a   :  { %1344 = vmatprep.subr.bf16.mxu1 %v2883_v4 }
 0x19d   :  { %1345 = vmatpush1.bf16.msra.mxu1 %v2881_v5 }
 0x19e   :  { %1346 = vmatprep.subr.bf16.mxu1 %v2886_v6 }
 0x1a1   :  { %1347 = vmatpush1.bf16.msra.mxu1 %v2884_v8  ;;  %v2905_v8 = vld [vmem:[%s4024_s4 + $0xf0] ss:$8 sps:$4 sm:$0xff]  }
 0x1a2   :  { %1348 = vmatprep.subr.bf16.mxu1 %v2889_v32  ;;  %v2907_v32 = vld [vmem:[%s4024_s4 + $0xf4] ss:$8 sps:$4 sm:$0xff]  }
 0x1a5   :  { %1349 = vmatpush1.bf16.msra.mxu1 %v2887_v50 }
 0x1a6   :  { %1350 = vmatprep.subr.bf16.mxu1 %v2892_v9 }
 0x1a9   :  { %1351 = vmatpush1.bf16.msra.mxu1 %v2890_v10 }
 0x1aa   :  { %1352 = vmatprep.subr.bf16.mxu1 %v2895_v11 }
 0x1ad   :  { %1353 = vmatpush1.bf16.msra.mxu1 %v2893_v12 }
 0x1ae   :  { %1354 = vmatprep.subr.bf16.mxu1 %v2898_v13 }
 0x1b1   :  { %1355 = vmatpush1.bf16.msra.mxu1 %v2896_v17 }
 0x1b2   :  { %1356 = vmatprep.subr.bf16.mxu1 %v2901_v18 }
 0x1b5   :  { %1357 = vmatpush1.bf16.msra.mxu1 %v2899_v19 }
 0x1b6   :  { %1358 = vmatprep.subr.bf16.mxu1 %v2904_v55  ;;  %v2940_v55 = vld [vmem:[%s4026_s6] sm:$0xff]  }
 0x1b7   :  { %1536 = vmatpush1.bf16.msra.mxu0 %v2940_v55  ;;  %v2931_v55 = vld [vmem:[%s4024_s4 + $0x174] ss:$8 sps:$4 sm:$0xff]  }
 0x1b8   :  { %1537 = vmatprep.subr.bf16.mxu0 %v3014_v54 }
 0x1b9   :  { %1359 = vmatpush1.bf16.msra.mxu1 %v2902_v59  ;;  %v2943_v59 = vld [vmem:[%s4026_s6 + $0x18] sm:$0xff]  }
 0x1ba   :  { %1360 = vmatprep.subr.bf16.mxu1 %v2907_v32 }
 0x1bd   :  { %1361 = vmatpush1.bf16.msra.mxu1 %v2905_v8 }
 0x242   :  { %v659_v20 = vpop.f32.mrb[0].mxu1  ;;  %v812_v21 = vpop.f32.mrb[16].mxu0 }
 0x243   :  { %v843_v22 = vmax.f32 %v659_v20, %v812_v21  ;;  %v661_v23 = vpop.f32.mrb[1].mxu1  ;;  %v814_v24 = vpop.f32.mrb[17].mxu0  ;;  %v2910_v21 = vld [vmem:[%s4024_s4 + $0x104] ss:$8 sps:$4 sm:$0xff]  }
 0x244   :  { %v662_v25 = vpop.f32.mrb[2].mxu1  ;;  %v815_v26 = vpop.f32.mrb[18].mxu0  ;;  %1383 = vmatprep.subr.bf16.mxu1 %v2910_v21 }
 0x245   :  { %851 = vst.msk [vmem:[#allocation3] sm:$0xff] %vm265_vm7, %v843_v22  ;;  %v844_v28 = vmax.f32 %v662_v25, %v815_v26  ;;  %v664_v29 = vpop.f32.mrb[3].mxu1  ;;  %v817_v15 = vpop.f32.mrb[19].mxu0 }
 0x247   :  { %852 = vst.msk [vmem:[#allocation3 + $0x8] sm:$0xff] %vm265_vm7, %v844_v28 }
 0x24a   :  { %v667_v14 = vpop.f32.mrb[4].mxu1  ;;  %v820_v30 = vpop.f32.mrb[20].mxu0 }
 0x24b   :  { %v845_v31 = vmax.f32 %v667_v14, %v820_v30  ;;  %v669_v33 = vpop.f32.mrb[5].mxu1  ;;  %v822_v56 = vpop.f32.mrb[21].mxu0 }
 0x24c   :  { %v670_v7 = vpop.f32.mrb[6].mxu1  ;;  %v823_v34 = vpop.f32.mrb[22].mxu0 }
 0x24d   :  { %853 = vst.msk [vmem:[#allocation3 + $0x10] sm:$0xff] %vm265_vm7, %v845_v31  ;;  %v846_v35 = vmax.f32 %v670_v7, %v823_v34  ;;  %v672_v36 = vpop.f32.mrb[7].mxu1  ;;  %v825_v37 = vpop.f32.mrb[23].mxu0 }
 0x24e   :  { %v861_v52 = vld [vmem:[#allocation3] ss:$2 sm:$0xff]  ;;  %v869_v53 = vld [vmem:[#allocation3 + $0x1] ss:$2 sm:$0xff] }
 0x24f   :  { %854 = vst.msk [vmem:[#allocation3 + $0x18] sm:$0xff] %vm265_vm7, %v846_v35  ;;  %v3551_v2 = vmax.f32 %v861_v52, %v869_v53 }
 0x251   :  { %v903_v13 = vrot.slane %v3551_v2, 2  ;;  %v884_v18 = vrot.slane %v3551_v2, 1  ;;  %v922_v15 = vrot.slane %v3551_v2, 3 }
 0x252   :  { %v675_v38 = vpop.f32.mrb[8].mxu1  ;;  %v828_v39 = vpop.f32.mrb[24].mxu0 }
 0x253   :  { %v847_v40 = vmax.f32 %v675_v38, %v828_v39  ;;  %v677_v41 = vpop.f32.mrb[9].mxu1  ;;  %v830_v42 = vpop.f32.mrb[25].mxu0 }
 0x254   :  { %v678_v43 = vpop.f32.mrb[10].mxu1  ;;  %v831_v44 = vpop.f32.mrb[26].mxu0 }
 0x255   :  { %855 = vst.msk [vmem:[#allocation3 + $0x20] sm:$0xff] %vm265_vm7, %v847_v40  ;;  %v848_v45 = vmax.f32 %v678_v43, %v831_v44  ;;  %v680_v16 = vpop.f32.mrb[11].mxu1  ;;  %v833_v27 = vpop.f32.mrb[27].mxu0  ;;  %v941_v43 = vrot.slane %v3551_v2, 4 }
 0x256   :  { %v863_v46 = vld [vmem:[#allocation3 + $0x10] ss:$2 sm:$0xff]  ;;  %v871_v49 = vld [vmem:[#allocation3 + $0x11] ss:$2 sm:$0xff] }
 0x257   :  { %856 = vst.msk [vmem:[#allocation3 + $0x28] sm:$0xff] %vm265_vm7, %v848_v45  ;;  %v3549_v63 = vmax.f32 %v863_v46, %v871_v49 }
 0x259   :  { %v904_v11 = vrot.slane %v3549_v63, 2  ;;  %v885_v12 = vrot.slane %v3549_v63, 1  ;;  %v923_v22 = vrot.slane %v3549_v63, 3  ;;  %v942_v40 = vrot.slane %v3549_v63, 4 }
 0x25a   :  { %v683_v57 = vpop.f32.mrb[12].mxu1  ;;  %v836_v58 = vpop.f32.mrb[28].mxu0 }
 0x25b   :  { %v849_v60 = vmax.f32 %v683_v57, %v836_v58  ;;  %v685_v61 = vpop.f32.mrb[13].mxu1  ;;  %v838_v62 = vpop.f32.mrb[29].mxu0  ;;  %v905_v23 = vsel %vm128_vm4, %v903_v13, %v904_v11  ;;  %v886_v25 = vsel %vm88_vm2, %v884_v18, %v885_v12  ;;  %v924_v33 = vsel %vm168_vm3, %v922_v15, %v923_v22  ;;  %v2941_v57 = vld [vmem:[%s4026_s6 + $0x8] sm:$0xff]   ;;  %v2942_v58 = vld [vmem:[%s4026_s6 + $0x10] sm:$0xff]  }
 0x25c   :  { %v686_v0 = vpop.f32.mrb[14].mxu1  ;;  %v839_v1 = vpop.f32.mrb[30].mxu0  ;;  %v943_v27 = vsel %vm208_vm5, %v941_v43, %v942_v40  ;;  %1538 = vmatpush1.bf16.msra.mxu0 %v2941_v57  ;;  %v2945_v61 = vld [vmem:[%s4026_s6 + $0x28] sm:$0xff]   ;;  %v2946_v62 = vld [vmem:[%s4026_s6 + $0x30] sm:$0xff]  }
 0x25d   :  { %857 = vst.msk [vmem:[#allocation3 + $0x30] sm:$0xff] %vm265_vm7, %v849_v60  ;;  %v850_v4 = vmax.f32 %v686_v0, %v839_v1  ;;  %v688_v5 = vpop.f32.mrb[15].mxu1  ;;  %v841_v6 = vpop.f32.mrb[31].mxu0  ;;  %1539 = vmatprep.subr.bf16.mxu0 %v3014_v54  ;;  %v2944_v60 = vld [vmem:[%s4026_s6 + $0x20] sm:$0xff]   ;;  %v2947_v0 = vld [vmem:[%s4026_s6 + $0x38] sm:$0xff]  }
 0x25e   :  { %v865_v50 = vld [vmem:[#allocation3 + $0x20] ss:$2 sm:$0xff]  ;;  %v873_v9 = vld [vmem:[#allocation3 + $0x21] ss:$2 sm:$0xff]  ;;  %v2929_v57 = vld [vmem:[%s4024_s4 + $0x170] ss:$8 sps:$4 sm:$0xff]  }
 0x25f   :  { %859 = vst.msk [vmem:[#allocation3 + $0x38] sm:$0xf] %vm858_vm11, %v850_v4  ;;  %v3561_v10 = vmax.f32 %v865_v50, %v873_v9 }
 0x260   :  { %1540 = vmatpush1.bf16.msra.mxu0 %v2942_v58  ;;  %v2934_v58 = vld [vmem:[%s4024_s4 + $0x184] ss:$8 sps:$4 sm:$0xff]  }
 0x261   :  { %v906_v17 = vrot.slane %v3561_v10, 2  ;;  %v887_v19 = vrot.slane %v3561_v10, 1  ;;  %v925_v20 = vrot.slane %v3561_v10, 3  ;;  %v944_v36 = vrot.slane %v3561_v10, 4  ;;  %1541 = vmatprep.subr.bf16.mxu0 %v3014_v54 }
 0x263   :  { %v907_v24 = vsel %vm128_vm4, %v904_v11, %v906_v17  ;;  %v888_v26 = vsel %vm88_vm2, %v885_v12, %v887_v19  ;;  %v926_v14 = vsel %vm168_vm3, %v923_v22, %v925_v20  ;;  %v945_v44 = vsel %vm208_vm5, %v942_v40, %v944_v36 }
 0x264   :  { %v2756_v28 = vpack.i.bf16 %v907_v24, %v905_v23  ;;  %v2751_v29 = vpack.i.bf16 %v888_v26, %v886_v25  ;;  %v2761_v7 = vpack.i.bf16 %v926_v14, %v924_v33  ;;  %v2781_v46 = vpack.i.bf16 %v945_v44, %v943_v27  ;;  %1542 = vmatpush1.bf16.msra.mxu0 %v2943_v59  ;;  %v2919_v44 = vld [vmem:[%s4024_s4 + $0x134] ss:$8 sps:$4 sm:$0xff]   ;;  %v2920_v27 = vld [vmem:[%s4024_s4 + $0x140] ss:$8 sps:$4 sm:$0xff]  }
 0x265   :  { %1543 = vmatprep.subr.bf16.mxu0 %v3014_v54  ;;  %v2932_v59 = vld [vmem:[%s4024_s4 + $0x180] ss:$8 sps:$4 sm:$0xff]  }
 0x266   :  { %2757 = vrot.lane.b32.xlu1 %v2756_v28, %s3015_s15  ;;  %2752 = vrot.lane.b32.xlu0 %v2751_v29, %s3011_s23  ;;  %v867_v30 = vld [vmem:[#allocation3 + $0x30] ss:$2 sm:$0xff]  ;;  %v875_v31 = vld [vmem:[#allocation3 + $0x31] ss:$2 sm:$0xff] }
 0x267   :  { %v3582_v56 = vmax.f32 %v867_v30, %v875_v31  ;;  %v2911_v30 = vld [vmem:[%s4024_s4 + $0x110] ss:$8 sps:$4 sm:$0xff]  }
 0x268   :  { %1544 = vmatpush1.bf16.msra.mxu0 %v2944_v60  ;;  %v2937_v60 = vld [vmem:[%s4024_s4 + $0x194] ss:$8 sps:$4 sm:$0xff]  }
 0x269   :  { %v908_v34 = vrot.slane %v3582_v56, 2  ;;  %v889_v35 = vrot.slane %v3582_v56, 1  ;;  %v927_v37 = vrot.slane %v3582_v56, 3  ;;  %v946_v16 = vrot.slane %v3582_v56, 4  ;;  %1545 = vmatprep.subr.bf16.mxu0 %v3014_v54 }
 0x26a   :  { %2762 = vrot.lane.b32.xlu0 %v2761_v7, %s3016_s16  ;;  %v2916_v7 = vld [vmem:[%s4024_s4 + $0x124] ss:$8 sps:$4 sm:$0xff]  }
 0x26b   :  { %v909_v38 = vsel %vm128_vm4, %v906_v17, %v908_v34  ;;  %v890_v39 = vsel %vm88_vm2, %v887_v19, %v889_v35  ;;  %v928_v45 = vsel %vm168_vm3, %v925_v20, %v927_v37  ;;  %v947_v52 = vsel %vm208_vm5, %v944_v36, %v946_v16 }
 0x26c   :  { %v2771_v41 = vpack.i.bf16 %v908_v34, %v909_v38  ;;  %v2766_v42 = vpack.i.bf16 %v889_v35, %v890_v39  ;;  %v2776_v49 = vpack.i.bf16 %v927_v37, %v928_v45  ;;  %v2786_v53 = vpack.i.bf16 %v946_v16, %v947_v52  ;;  %1546 = vmatpush1.bf16.msra.mxu0 %v2945_v61  ;;  %v2922_v16 = vld [vmem:[%s4024_s4 + $0x144] ss:$8 sps:$4 sm:$0xff]  }
 0x26d   :  { %1547 = vmatprep.subr.bf16.mxu0 %v3014_v54  ;;  %v2928_v52 = vld [vmem:[%s4024_s4 + $0x164] ss:$8 sps:$4 sm:$0xff]  }
 0x26e   :  { %2772 = vrot.lane.b32.xlu0 %v2771_v41, %s3015_s15  ;;  %2767 = vrot.lane.b32.xlu1 %v2766_v42, %s3011_s23  ;;  %v1038_v61 = vld [vmem:[%s4024_s4 + $0x1a0] sm:$0x33] }
 0x270   :  { %1548 = vmatpush1.bf16.msra.mxu0 %v2946_v62  ;;  %v2935_v62 = vld [vmem:[%s4024_s4 + $0x190] ss:$8 sps:$4 sm:$0xff]  }
 0x271   :  { %1549 = vmatprep.subr.bf16.mxu0 %v3014_v54 }
 0x272   :  { %2782 = vrot.lane.b32.xlu0 %v2781_v46, %s3017_s17  ;;  %2777 = vrot.lane.b32.xlu1 %v2776_v49, %s3016_s16  ;;  %v2925_v46 = vld [vmem:[%s4024_s4 + $0x154] ss:$8 sps:$4 sm:$0xff]   ;;  %v2923_v49 = vld [vmem:[%s4024_s4 + $0x150] ss:$8 sps:$4 sm:$0xff]  }
 0x274   :  { %1550 = vmatpush1.bf16.msra.mxu0 %v2947_v0  ;;  %v2417_v0 = vcombine.high %v1038_v61, %v1038_v61 }
 0x275   :  { %1551 = vmatprep.subr.bf16.mxu0 %v3014_v54 }
 0x276   :  { %2787 = vrot.lane.b32.xlu1 %v2786_v53, %s3017_s17  ;;  %v2926_v53 = vld [vmem:[%s4024_s4 + $0x160] ss:$8 sps:$4 sm:$0xff]  }
 0x2d8   :  { %v2758_v1 = vpop.permute.xlu1 %2757  ;;  %v2753_v4 = vpop.permute.xlu0 %2752 }
 0x2d9   :  { %v2760_v5 = vunpack.i.h.bf16 %v2758_v1  ;;  %v2759_v6 = vunpack.i.l.bf16 %v2758_v1  ;;  %v2755_v8 = vunpack.i.h.bf16 %v2753_v4  ;;  %v2754_v32 = vunpack.i.l.bf16 %v2753_v4 }
 0x2da   :  { %v2416_v1 = vcombine.low %v1038_v61, %v1038_v61  ;;  %v2962_v61 = vld [vmem:[%s4027_s7 + $0x88] sm:$0xff]  }
 0x2db   :  { %v961_v12 = vsel %vm265_vm7, %v3549_v63, %v2755_v8  ;;  %v965_v13 = vsel %vm609_vm10, %v2755_v8, %v2760_v5  ;;  %v960_v17 = vsel %vm265_vm7, %v3551_v2, %v2754_v32  ;;  %v964_v18 = vsel %vm609_vm10, %v2754_v32, %v2759_v6  ;;  %v2908_v63 = vld [vmem:[%s4024_s4 + $0x100] ss:$8 sps:$4 sm:$0xff]   ;;  %v2913_v2 = vld [vmem:[%s4024_s4 + $0x114] ss:$8 sps:$4 sm:$0xff]  }
 0x2dc   :  { %v3632_v50 = vpop.permute.xlu0 %2762  ;;  %v978_v24 = vpack.c.bf16 %v961_v12, %v960_v17  ;;  %v1325_v5 = vsel %vm1323_vm14, %v2416_v1, 0  ;;  %v2965_v1 = vld [vmem:[%s4027_s7 + $0x90] sm:$0xff]  }
 0x2dd   :  { %v2765_v9 = vunpack.i.h.bf16 %v3632_v50  ;;  %v2764_v11 = vunpack.i.l.bf16 %v3632_v50  ;;  %v2948_v50 = vld [vmem:[%s4026_s6 + $0x40] sm:$0xff]  }
 0x2de   :  { %1552 = vmatpush1.bf16.msra.mxu0 %v2948_v50 }
 0x2df   :  { %v969_v19 = vsel %vm968_vm12, %v964_v18, %v2764_v11  ;;  %v970_v20 = vsel %vm968_vm12, %v965_v13, %v2765_v9  ;;  %1553 = vmatprep.subr.bf16.mxu0 %v3014_v54 }
 0x2e0   :  { %v2773_v21 = vpop.permute.xlu0 %2772  ;;  %v2768_v22 = vpop.permute.xlu1 %2767  ;;  %v979_v23 = vpack.c.bf16 %v970_v20, %v969_v19  ;;  %v1039_v20 = vld [vmem:[%s4025_s5] sm:$0x3] }
 0x2e1   :  { %v2775_v25 = vunpack.i.h.bf16 %v2773_v21  ;;  %v2774_v26 = vunpack.i.l.bf16 %v2773_v21  ;;  %v2770_v28 = vunpack.i.h.bf16 %v2768_v22  ;;  %v2769_v29 = vunpack.i.l.bf16 %v2768_v22 }
 0x2e2   :  { %1362 = vmatprep.mubr.bf16.mxu1 %v979_v23  ;;  %v1044_v21 = vrot.slane %v1039_v20, %v313_v48  ;;  %v1048_v22 = vrot.slane %v1039_v20, %v317_v51 }
 0x2e3   :  { %1363 = vmatmul.mubr.bf16.vlgmr.msra.gmra.mrb[16].mxu1 %v978_v24  ;;  %v967_v34 = vsel %vm609_vm10, %v2770_v28, %v2775_v25  ;;  %v966_v35 = vsel %vm609_vm10, %v2769_v29, %v2774_v26  ;;  %v962_v36 = vsel %vm265_vm7, %v3561_v10, %v2769_v29  ;;  %v963_v40 = vsel %vm265_vm7, %v3582_v56, %v2770_v28  ;;  %v2914_v10 = vld [vmem:[%s4024_s4 + $0x120] ss:$8 sps:$4 sm:$0xff]   ;;  %v2917_v56 = vld [vmem:[%s4024_s4 + $0x130] ss:$8 sps:$4 sm:$0xff]  }
 0x2e4   :  { %1384 = vmatpush1.bf16.msra.mxu1 %v2908_v63  ;;  %v3654_v15 = vpop.permute.xlu0 %2782  ;;  %v3656_v14 = vpop.permute.xlu1 %2777  ;;  %v982_v43 = vpack.c.bf16 %v963_v40, %v962_v36  ;;  %v2951_v40 = vld [vmem:[%s4026_s6 + $0x58] sm:$0xff]  }
 0x2e5   :  { %v2780_v31 = vunpack.i.h.bf16 %v3656_v14  ;;  %v2779_v33 = vunpack.i.l.bf16 %v3656_v14  ;;  %1385 = vmatprep.subr.bf16.mxu1 %v2913_v2  ;;  %v2785_v37 = vunpack.i.h.bf16 %v3654_v15  ;;  %v2784_v38 = vunpack.i.l.bf16 %v3654_v15 }
 0x2e7   :  { %v971_v39 = vsel %vm968_vm12, %v966_v35, %v2779_v33  ;;  %v972_v41 = vsel %vm968_vm12, %v967_v34, %v2780_v31  ;;  %v981_v45 = vpack.c.bf16 %v2785_v37, %v2784_v38  ;;  %v975_v6 = vsel %vm973_vm15, %v2765_v9, %v2785_v37 }
 0x2e8   :  { %1386 = vmatpush1.bf16.msra.mxu1 %v2911_v30  ;;  %v983_v42 = vpack.c.bf16 %v972_v41, %v971_v39  ;;  %v2788_v4 = vpop.permute.xlu1 %2787  ;;  %v974_v8 = vsel %vm973_vm15, %v2764_v11, %v2784_v38  ;;  %v2949_v11 = vld [vmem:[%s4026_s6 + $0x48] sm:$0xff]  }
 0x2e9   :  { %1387 = vmatprep.subr.bf16.mxu1 %v2916_v7  ;;  %v2790_v32 = vunpack.i.h.bf16 %v2788_v4  ;;  %v2789_v12 = vunpack.i.l.bf16 %v2788_v4  ;;  %v980_v13 = vpack.c.bf16 %v975_v6, %v974_v8  ;;  %1554 = vmatpush1.bf16.msra.mxu0 %v2949_v11  ;;  %v2969_v4 = vld [vmem:[%s4027_s7 + $0x10] sm:$0xff]   ;;  %v2968_v6 = vld [vmem:[%s4027_s7 + $0x98] sm:$0xff]  }
 0x2ea   :  { %1372 = vmatprep.mubr.bf16.mxu1 %v983_v42  ;;  %1665 = vmatprep.subr.bf16.mxu0 %v3014_v54  ;;  %v2972_v8 = vld [vmem:[%s4027_s7 + $0x18] sm:$0xff]  }
 0x2eb   :  { %1373 = vmatmul.mubr.bf16.gmra.mrb[20].mxu1 %v982_v43  ;;  %v985_v17 = vpack.c.bf16 %v2790_v32, %v2789_v12  ;;  %v976_v18 = vsel %vm973_vm15, %v2779_v33, %v2789_v12  ;;  %v977_v9 = vsel %vm973_vm15, %v2780_v31, %v2790_v32  ;;  %v2973_v32 = vld [vmem:[%s4027_s7 + $0x60] sm:$0xff]  }
 0x2ec   :  { %1388 = vmatpush1.bf16.msra.mxu1 %v2914_v10  ;;  %2419 = vmatprep.mubr.msk.bf16.mxu1 %vm1316_vm13, %v981_v45  ;;  %v984_v19 = vpack.c.bf16 %v977_v9, %v976_v18  ;;  %v2971_v12 = vld [vmem:[%s4027_s7 + $0xa0] sm:$0xff]   ;;  %v2974_v18 = vld [vmem:[%s4027_s7 + $0xa8] sm:$0xff]  }
 0x2ed   :  { %1389 = vmatprep.subr.bf16.mxu1 %v2919_v44  ;;  %v2978_v9 = vld [vmem:[%s4027_s7 + $0x28] sm:$0xff]  }
 0x2f0   :  { %1390 = vmatpush1.bf16.msra.mxu1 %v2917_v56  ;;  %v2952_v56 = vld [vmem:[%s4026_s6 + $0x60] sm:$0xff]  }
 0x2f1   :  { %1391 = vmatprep.subr.bf16.mxu1 %v2922_v16  ;;  %v2953_v16 = vld [vmem:[%s4026_s6 + $0x68] sm:$0xff]  }
 0x2f4   :  { %1392 = vmatpush1.bf16.msra.mxu1 %v2920_v27  ;;  %v2954_v27 = vld [vmem:[%s4026_s6 + $0x70] sm:$0xff]  }
 0x2f5   :  { %1393 = vmatprep.subr.bf16.mxu1 %v2925_v46  ;;  %v2955_v46 = vld [vmem:[%s4026_s6 + $0x78] sm:$0xff]  }
 0x2f8   :  { %1394 = vmatpush1.bf16.msra.mxu1 %v2923_v49  ;;  %v2956_v49 = vld [vmem:[%s4026_s6 + $0x80] sm:$0xff]  }
 0x2f9   :  { %1395 = vmatprep.subr.bf16.mxu1 %v2928_v52  ;;  %v2957_v52 = vld [vmem:[%s4026_s6 + $0x88] sm:$0xff]  }
 0x2fc   :  { %1396 = vmatpush1.bf16.msra.mxu1 %v2926_v53  ;;  %v2958_v53 = vld [vmem:[%s4026_s6 + $0x90] sm:$0xff]  }
 0x2fd   :  { %1397 = vmatprep.subr.bf16.mxu1 %v2931_v55  ;;  %v2959_v55 = vld [vmem:[%s4026_s6 + $0x98] sm:$0xff]  }
 0x300   :  { %1398 = vmatpush1.bf16.msra.mxu1 %v2929_v57  ;;  %v2960_v57 = vld [vmem:[%s4027_s7 + $0x80] sm:$0xff]  }
 0x301   :  { %1399 = vmatprep.subr.bf16.mxu1 %v2934_v58  ;;  %v2961_v58 = vld [vmem:[%s4027_s7 + $0x40] sm:$0xff]  }
 0x304   :  { %1400 = vmatpush1.bf16.msra.mxu1 %v2932_v59  ;;  %v2963_v59 = vld [vmem:[%s4027_s7] sm:$0xff]  }
 0x305   :  { %1401 = vmatprep.subr.bf16.mxu1 %v2937_v60  ;;  %v2964_v60 = vld [vmem:[%s4027_s7 + $0x48] sm:$0xff]  }
 0x308   :  { %1402 = vmatpush1.bf16.msra.mxu1 %v2935_v62  ;;  %v2966_v62 = vld [vmem:[%s4027_s7 + $0x8] sm:$0xff]  }
 0x309   :  { %2418 = vmatprep.subr.msk.bf16.mxu1 %vm1323_vm14, %v2417_v0  ;;  %v2967_v0 = vld [vmem:[%s4027_s7 + $0x50] sm:$0xff]  }
 0x30c   :  { %1404 = vmatpush1.bf16.msra.mxu1 %v1325_v5  ;;  %v2970_v5 = vld [vmem:[%s4027_s7 + $0x58] sm:$0xff]  }
 0x30d   :  { %2497 = vmatprep.subr.bf16.mxu1 %v2961_v58 }
 0x30f   :  { %1416 = vmatmul.mubr.bf16.vlgmr.msra.gmra.mrb[16].mxu1 %v980_v13  ;;  %v2975_v13 = vld [vmem:[%s4027_s7 + $0x20] sm:$0xff]  }
 0x310   :  { %2420 = vmatprep.mubr.msk.bf16.mxu1 %vm1316_vm13, %v985_v17  ;;  %2498 = vmatpush3.bf16.msra.mxu1 %v2963_v59  ;;  %v2976_v17 = vld [vmem:[%s4027_s7 + $0x68] sm:$0xff]   ;;  %v3019_v59 = vmov 0.0|0.0  }
 0x311   :  { %2499 = vmatprep.subr.bf16.mxu1 %v2964_v60 }
 0x314   :  { %2500 = vmatpush3.bf16.msra.mxu1 %v2966_v62 }
 0x315   :  { %2501 = vmatprep.subr.bf16.mxu1 %v2967_v0 }
 0x317   :  { %1426 = vmatmul.mubr.bf16.gmra.mrb[20].mxu1 %v984_v19  ;;  %v2977_v19 = vld [vmem:[%s4027_s7 + $0xb0] sm:$0xff]  }
 0x318   :  { %2502 = vmatpush3.bf16.msra.mxu1 %v2969_v4 }
 0x319   :  { %2503 = vmatprep.subr.bf16.mxu1 %v2970_v5 }
 0x31c   :  { %2504 = vmatpush3.bf16.msra.mxu1 %v2972_v8 }
 0x31d   :  { %2505 = vmatprep.subr.bf16.mxu1 %v2973_v32 }
 0x320   :  { %2506 = vmatpush3.bf16.msra.mxu1 %v2975_v13 }
 0x321   :  { %2507 = vmatprep.subr.bf16.mxu1 %v2976_v17 }
 0x324   :  { %2508 = vmatpush3.bf16.msra.mxu1 %v2978_v9 }
 0x3e2   :  { %v1417_v23 = vpop.f32.mrb[16].mxu1 }
 0x3e3   :  { %v2641_v63 = vadd.f32 %v1417_v23, %v1044_v21  ;;  %v1419_v24 = vpop.f32.mrb[17].mxu1 }
 0x3e4   :  { %v2642_v2 = vadd.f32 %v1419_v24, %v1048_v22  ;;  %v1421_v25 = vpop.f32.mrb[18].mxu1 }
 0x3e5   :  { %v2643_v26 = vadd.f32 %v1421_v25, %v1044_v21  ;;  %v1423_v28 = vpop.f32.mrb[19].mxu1  ;;  %v1436_v15 = vmax.f32 %v2641_v63, 0.0 }
 0x3e6   :  { %v2644_v29 = vadd.f32 %v1423_v28, %v1048_v22  ;;  %v1437_v30 = vmax.f32 %v2642_v2, 0.0 }
 0x3e7   :  { %v1438_v14 = vmax.f32 %v2643_v26, 0.0 }
 0x3e8   :  { %v1439_v31 = vmax.f32 %v2644_v29, 0.0 }
 0x3e9   :  { %v1444_v33 = vpack.c.bf16 %v1438_v14, %v1436_v15 }
 0x3ea   :  { %v1445_v7 = vpack.c.bf16 %v1439_v31, %v1437_v30  ;;  %v1427_v34 = vpop.f32.mrb[20].mxu1 }
 0x3eb   :  { %v2645_v48 = vadd.f32 %v1427_v34, %v1044_v21  ;;  %v1429_v51 = vpop.f32.mrb[21].mxu1 }
 0x3ec   :  { %v2646_v35 = vadd.f32 %v1429_v51, %v1048_v22  ;;  %v1431_v36 = vpop.f32.mrb[22].mxu1  ;;  %2431 = vmatprep.mubr.msk.bf16.mxu0 %vm1528_vm0, %v1445_v7  ;;  %v2979_v51 = vld [vmem:[%s4027_s7 + $0x70] sm:$0xff]  }
 0x3ed   :  { %v2647_v37 = vadd.f32 %v1431_v36, %v1044_v21  ;;  %v1433_v38 = vpop.f32.mrb[23].mxu1  ;;  %1568 = vmatmul.mubr.bf16.vlgmr.msra.gmra.mrb[32].mxu0 %v1444_v33  ;;  %v1440_v41 = vmax.f32 %v2645_v48, 0.0  ;;  %v2981_v36 = vld [vmem:[%s4027_s7 + $0x30] sm:$0xff]   ;;  %2509 = vmatprep.subr.bf16.mxu1 %v2979_v51  ;;  %v2092_v51 = vld [vmem:[%s4029_s9 + $0x40] sm:$0xff] }
 0x3ee   :  { %v2648_v39 = vadd.f32 %v1433_v38, %v1048_v22  ;;  %1666 = vmatpush1.bf16.msra.mxu0 %v2950_v47  ;;  %v1441_v10 = vmax.f32 %v2646_v35, 0.0  ;;  %v2980_v35 = vld [vmem:[%s4027_s7 + $0xb8] sm:$0xff]   ;;  %2510 = vmatpush3.bf16.msra.mxu1 %v2981_v36 }
 0x3ef   :  { %v1442_v42 = vmax.f32 %v2647_v37, 0.0  ;;  %1667 = vmatprep.subr.bf16.mxu0 %v3014_v54  ;;  %v2982_v38 = vld [vmem:[%s4027_s7 + $0x78] sm:$0xff]  }
 0x3f0   :  { %v1443_v43 = vmax.f32 %v2648_v39, 0.0  ;;  %v2983_v39 = vld [vmem:[%s4027_s7 + $0xc0] sm:$0xff]   ;;  %2511 = vmatprep.subr.bf16.mxu1 %v2982_v38  ;;  %v2095_v38 = vld [vmem:[%s4029_s9 + $0x58] sm:$0xff] }
 0x3f1   :  { %v1446_v44 = vpack.c.bf16 %v1442_v42, %v1440_v41  ;;  %v2984_v42 = vld [vmem:[%s4027_s7 + $0x38] sm:$0xff]   ;;  %s3018_s7 = smov 32  }
 0x3f2   :  { %v1447_v45 = vpack.c.bf16 %v1443_v43, %v1441_v10  ;;  %1668 = vmatpush1.bf16.msra.mxu0 %v2951_v40  ;;  %2512 = vmatpush3.bf16.msra.mxu1 %v2984_v42 }
 0x3f3   :  { %1669 = vmatprep.subr.bf16.mxu0 %v3014_v54  ;;  %2605 = vmatprep.subr.bf16.mxu1 %v3019_v59 }
 0x3f4   :  { %2432 = vmatprep.mubr.msk.bf16.mxu0 %vm1528_vm0, %v1447_v45 }
 0x3f5   :  { %1576 = vmatmul.mubr.bf16.gmra.mrb[36].mxu0 %v1446_v44 }
 0x3f6   :  { %1670 = vmatpush1.bf16.msra.mxu0 %v2952_v56  ;;  %2463 = vmatprep.mubr.msk.bf16.mxu0 %vm1528_vm0, %v1445_v7 }
 0x3f7   :  { %1671 = vmatprep.subr.bf16.mxu0 %v3014_v54 }
 0x3fa   :  { %1672 = vmatpush1.bf16.msra.mxu0 %v2953_v16 }
 0x3fb   :  { %1673 = vmatprep.subr.bf16.mxu0 %v3014_v54 }
 0x3fe   :  { %1674 = vmatpush1.bf16.msra.mxu0 %v2954_v27 }
 0x3ff   :  { %1675 = vmatprep.subr.bf16.mxu0 %v3014_v54 }
 0x402   :  { %1676 = vmatpush1.bf16.msra.mxu0 %v2955_v46 }
 0x403   :  { %1677 = vmatprep.subr.bf16.mxu0 %v3014_v54 }
 0x406   :  { %1678 = vmatpush1.bf16.msra.mxu0 %v2956_v49 }
 0x407   :  { %1679 = vmatprep.subr.bf16.mxu0 %v3014_v54 }
 0x40a   :  { %1680 = vmatpush1.bf16.msra.mxu0 %v2957_v52 }
 0x40b   :  { %1681 = vmatprep.subr.bf16.mxu0 %v3014_v54 }
 0x40e   :  { %1682 = vmatpush1.bf16.msra.mxu0 %v2958_v53 }
 0x40f   :  { %1683 = vmatprep.subr.bf16.mxu0 %v3014_v54 }
 0x412   :  { %1684 = vmatpush1.bf16.msra.mxu0 %v2959_v55 }
 0x413   :  { %2036 = vmatprep.subr.bf16.mxu0 %v3014_v54 }
 0x415   :  { %1698 = vmatmul.mubr.bf16.vlgmr.msra.gmra.mrb[40].mxu0 %v1444_v33 }
 0x416   :  { %2464 = vmatprep.mubr.msk.bf16.mxu0 %vm1528_vm0, %v1447_v45  ;;  %2037 = vmatpush1.bf16.msra.mxu0 %v2960_v57 }
 0x417   :  { %2038 = vmatprep.subr.bf16.mxu0 %v3014_v54 }
 0x41a   :  { %2039 = vmatpush1.bf16.msra.mxu0 %v2962_v61 }
 0x41b   :  { %2040 = vmatprep.subr.bf16.mxu0 %v3014_v54 }
 0x41d   :  { %1706 = vmatmul.mubr.bf16.gmra.mrb[44].mxu0 %v1446_v44 }
 0x41e   :  { %2041 = vmatpush1.bf16.msra.mxu0 %v2965_v1 }
 0x41f   :  { %2042 = vmatprep.subr.bf16.mxu0 %v3014_v54 }
 0x422   :  { %2043 = vmatpush1.bf16.msra.mxu0 %v2968_v6 }
 0x423   :  { %2044 = vmatprep.subr.bf16.mxu0 %v3014_v54 }
 0x426   :  { %2045 = vmatpush1.bf16.msra.mxu0 %v2971_v12 }
 0x427   :  { %2046 = vmatprep.subr.bf16.mxu0 %v3014_v54 }
 0x42a   :  { %2047 = vmatpush1.bf16.msra.mxu0 %v2974_v18 }
 0x42b   :  { %2048 = vmatprep.subr.bf16.mxu0 %v3014_v54 }
 0x42e   :  { %2049 = vmatpush1.bf16.msra.mxu0 %v2977_v19 }
 0x42f   :  { %2050 = vmatprep.subr.bf16.mxu0 %v3014_v54 }
 0x432   :  { %2051 = vmatpush1.bf16.msra.mxu0 %v2980_v35  ;;  %v2093_v35 = vld [vmem:[%s4029_s9 + $0x48] sm:$0xff] }
 0x433   :  { %2052 = vmatprep.subr.bf16.mxu0 %v3014_v54  ;;  %v2618_v36 = vpack.c.bf16 %v2093_v35, %v2092_v51 }
 0x436   :  { %2053 = vmatpush1.bf16.msra.mxu0 %v2983_v39 }
 0x437   :  { %2626 = vmatprep.subr.bf16.mxu0 %v3019_v59 }
 0x4c0   :  { %v1569_v50 = vpop.f32.mrb[32].mxu0 }
 0x4c1   :  { %v1571_v11 = vpop.f32.mrb[33].mxu0 }
 0x4c2   :  { %v1572_v20 = vpop.f32.mrb[34].mxu0 }
 0x4c3   :  { %v1574_v21 = vpop.f32.mrb[35].mxu0 }
 0x4c4   :  { %v2085_v21 = vld [vmem:[%s4029_s9 + $0x8] sm:$0xff] }
 0x4c8   :  { %v1577_v22 = vpop.f32.mrb[36].mxu0 }
 0x4c9   :  { %v1579_v23 = vpop.f32.mrb[37].mxu0 }
 0x4ca   :  { %v1580_v63 = vpop.f32.mrb[38].mxu0 }
 0x4cb   :  { %v1582_v24 = vpop.f32.mrb[39].mxu0 }
 0x4e8   :  { %v1699_v2 = vpop.f32.mrb[40].mxu0 }
 0x4e9   :  { %v1714_v25 = vmax.f32 %v1569_v50, %v1699_v2  ;;  %v1701_v26 = vpop.f32.mrb[41].mxu0 }
 0x4ea   :  { %v1702_v28 = vpop.f32.mrb[42].mxu0 }
 0x4eb   :  { %1718 = vst.msk [vmem:[#allocation4] sm:$0xff] %vm973_vm15, %v1714_v25  ;;  %v1715_v29 = vmax.f32 %v1572_v20, %v1702_v28  ;;  %v1704_v15 = vpop.f32.mrb[43].mxu0  ;;  %v2084_v20 = vld [vmem:[%s4029_s9] sm:$0xff] }
 0x4ec   :  { %v2606_v28 = vpack.c.bf16 %v2085_v21, %v2084_v20  ;;  %v2086_v15 = vld [vmem:[%s4029_s9 + $0x10] sm:$0xff]  ;;  %v2492_v21 = vld [vmem:[%s4030_s10] ss:$0 sm:$0xff] }
 0x4ed   :  { %1719 = vst.msk [vmem:[#allocation4 + $0x8] sm:$0xff] %vm973_vm15, %v1715_v29  ;;  %v2190_v20 = vld [vmem:[%s4031_s11 + $0x50] sm:$0xf] }
 0x4f0   :  { %v1707_v14 = vpop.f32.mrb[44].mxu0 }
 0x4f1   :  { %v1716_v30 = vmax.f32 %v1577_v22, %v1707_v14  ;;  %v1709_v31 = vpop.f32.mrb[45].mxu0  ;;  %v2087_v14 = vld [vmem:[%s4029_s9 + $0x18] sm:$0xff] }
 0x4f2   :  { %v1710_v33 = vpop.f32.mrb[46].mxu0  ;;  %v2088_v31 = vld [vmem:[%s4029_s9 + $0x20] sm:$0xff] }
 0x4f3   :  { %1720 = vst.msk [vmem:[#allocation4 + $0x10] sm:$0xff] %vm973_vm15, %v1716_v30  ;;  %v1717_v7 = vmax.f32 %v1580_v63, %v1710_v33  ;;  %v1712_v34 = vpop.f32.mrb[47].mxu0  ;;  %v2609_v30 = vpack.c.bf16 %v2087_v14, %v2086_v15  ;;  %v2089_v33 = vld [vmem:[%s4029_s9 + $0x28] sm:$0xff] }
 0x4f4   :  { %v1724_v47 = vld [vmem:[#allocation4] ss:$2 sm:$0xff]  ;;  %v1728_v48 = vld [vmem:[#allocation4 + $0x1] ss:$2 sm:$0xff]  ;;  %v2090_v34 = vld [vmem:[%s4029_s9 + $0x30] sm:$0xff] }
 0x4f5   :  { %1722 = vst.msk [vmem:[#allocation4 + $0x18] sm:$0xf] %vm1721_vm1, %v1717_v7  ;;  %v1731_v37 = vmax.f32 %v1724_v47, %v1728_v48  ;;  %v2612_v7 = vpack.c.bf16 %v2089_v33, %v2088_v31  ;;  %v2091_v47 = vld [vmem:[%s4029_s9 + $0x38] sm:$0xff] }
 0x4f6   :  { %v2615_v48 = vpack.c.bf16 %v2091_v47, %v2090_v34 }
 0x4f7   :  { %v1744_v43 = vrot.slane %v1731_v37, 2  ;;  %v1735_v44 = vrot.slane %v1731_v37, 1  ;;  %v1762_v49 = vrot.slane %v1731_v37, 4  ;;  %v1753_v52 = vrot.slane %v1731_v37, 3 }
 0x4fc   :  { %v1726_v40 = vld [vmem:[#allocation4 + $0x10] ss:$2 sm:$0xff]  ;;  %v1730_v41 = vld [vmem:[#allocation4 + $0x11] ss:$2 sm:$0xff] }
 0x4fd   :  { %v1732_v10 = vmax.f32 %v1726_v40, %v1730_v41  ;;  %v2096_v40 = vld [vmem:[%s4029_s9 + $0x60] sm:$0xff]  ;;  %v2097_v41 = vld [vmem:[%s4029_s9 + $0x68] sm:$0xff] }
 0x4fe   :  { %v2624_v42 = vpack.c.bf16 %v2097_v41, %v2096_v40 }
 0x4ff   :  { %v1745_v54 = vrot.slane %v1732_v10, 2  ;;  %v1736_v45 = vrot.slane %v1732_v10, 1  ;;  %v1763_v56 = vrot.slane %v1732_v10, 4  ;;  %v1754_v16 = vrot.slane %v1732_v10, 3 }
 0x501   :  { %v1746_v27 = vsel %vm128_vm4, %v1744_v43, %v1745_v54  ;;  %v1737_v46 = vsel %vm88_vm2, %v1735_v44, %v1736_v45  ;;  %v1764_v57 = vsel %vm208_vm5, %v1762_v49, %v1763_v56  ;;  %v1755_v58 = vsel %vm168_vm3, %v1753_v52, %v1754_v16  ;;  %v2180_v43 = vld [vmem:[%s4031_s11] sm:$0xff]  ;;  %v2181_v44 = vld [vmem:[%s4031_s11 + $0x8] sm:$0xff]  ;;  %v2186_v52 = vld [vmem:[%s4031_s11 + $0x30] sm:$0xff] }
 0x502   :  { %v2796_v53 = vpack.i.bf16 %v1745_v54, %v1746_v27  ;;  %v2791_v55 = vpack.i.bf16 %v1736_v45, %v1737_v46  ;;  %v2806_v60 = vpack.i.bf16 %v1763_v56, %v1764_v57  ;;  %v2801_v61 = vpack.i.bf16 %v1754_v16, %v1755_v58  ;;  %v2182_v54 = vld [vmem:[%s4031_s11 + $0x10] sm:$0xff]  ;;  %v2183_v56 = vld [vmem:[%s4031_s11 + $0x18] sm:$0xff]  ;;  %v2184_v27 = vld [vmem:[%s4031_s11 + $0x20] sm:$0xff] }
 0x503   :  { %vm1777_vm2 = vcmask 523264   ;;  %vm1991_vm3 = vcmask 130048   ;;  %vm3021_vm4 = vmmov 0   ;;  %v2627_v45 = vpack.c.bf16 %v2181_v44, %v2180_v43  ;;  %v2185_v46 = vld [vmem:[%s4031_s11 + $0x28] sm:$0xff] }
 0x504   :  { %2797 = vrot.lane.b32.xlu1 %v2796_v53, %s3018_s7  ;;  %2792 = vrot.lane.b32.xlu0 %v2791_v55, %s3017_s17  ;;  %v2630_v16 = vpack.c.bf16 %v2183_v56, %v2182_v54  ;;  %v2633_v49 = vpack.c.bf16 %v2185_v46, %v2184_v27  ;;  %v2187_v53 = vld [vmem:[%s4031_s11 + $0x38] sm:$0xff] }
 0x505   :  { %v2636_v55 = vpack.c.bf16 %v2187_v53, %v2186_v52 }
 0x508   :  { %2807 = vrot.lane.b32.xlu1 %v2806_v60, %s3020_s24  ;;  %2802 = vrot.lane.b32.xlu0 %v2801_v61, %s3013_s29 }
 0x576   :  { %v2798_v62 = vpop.permute.xlu1 %2797  ;;  %v2793_v0 = vpop.permute.xlu0 %2792 }
 0x577   :  { %v2800_v1 = vunpack.i.h.bf16 %v2798_v62  ;;  %v2799_v4 = vunpack.i.l.bf16 %v2798_v62  ;;  %v2795_v5 = vunpack.i.h.bf16 %v2793_v0  ;;  %v2794_v6 = vunpack.i.l.bf16 %v2793_v0  ;;  %v2465_v62 = vld [vmem:[%s4028_s8] ss:$0 sm:$0xff] }
 0x579   :  { %v1772_v9 = vsel %vm973_vm15, %v1732_v10, %v2795_v5  ;;  %v1774_v19 = vsel %vm1528_vm0, %v2795_v5, %v2800_v1  ;;  %v1771_v50 = vsel %vm973_vm15, %v1731_v37, %v2794_v6  ;;  %v1773_v11 = vsel %vm1528_vm0, %v2794_v6, %v2799_v4  ;;  %v2094_v37 = vld [vmem:[%s4029_s9 + $0x50] sm:$0xff] }
 0x57a   :  { %v2808_v8 = vpop.permute.xlu1 %2807  ;;  %v2803_v32 = vpop.permute.xlu0 %2802  ;;  %v1780_v29 = vpack.c.bf16 %v1772_v9, %v1771_v50  ;;  %v2621_v39 = vpack.c.bf16 %v2095_v38, %v2094_v37  ;;  %v2098_v10 = vld [vmem:[%s4029_s9 + $0x70] sm:$0xff]  ;;  %v2189_v50 = vld [vmem:[%s4031_s11 + $0x48] sm:$0xff] }
 0x57b   :  { %v2810_v12 = vunpack.i.h.bf16 %v2808_v8  ;;  %v2809_v13 = vunpack.i.l.bf16 %v2808_v8  ;;  %v2805_v17 = vunpack.i.h.bf16 %v2803_v32  ;;  %v2804_v18 = vunpack.i.l.bf16 %v2803_v32 }
 0x57d   :  { %v1783_v22 = vpack.c.bf16 %v2810_v12, %v2809_v13  ;;  %v1779_v23 = vsel %vm1777_vm2, %v2805_v17, %v2810_v12  ;;  %v1778_v63 = vsel %vm1777_vm2, %v2804_v18, %v2809_v13  ;;  %v1775_v24 = vsel %vm274_vm8, %v1773_v11, %v2804_v18 }
 0x57e   :  { %v1782_v2 = vpack.c.bf16 %v1779_v23, %v1778_v63  ;;  %v1776_v25 = vsel %vm274_vm8, %v1774_v19, %v2805_v17  ;;  %vm2081_vm8 = vcmask 977920   ;;  %v2188_v19 = vld [vmem:[%s4031_s11 + $0x40] sm:$0xff]  ;;  %s2985_s11 = scalar_lea.vmem %s2283_s30, 32 }
 0x57f   :  { %2491 = vmatprep.mubr.msk.bf16.mxu0 %vm1991_vm3, %v1783_v22  ;;  %v1781_v26 = vpack.c.bf16 %v1776_v25, %v1775_v24  ;;  %v2639_v11 = vpack.c.bf16 %v2189_v50, %v2188_v19  ;;  %p2986_p0 = scmp.ne.s32.totalorder %s2283_s30, %s2985_s11  ;;  %p2991_p2 = scmp.lt.s32.totalorder %s2985_s11, %s2985_s11 }
 0x580   :  { %2069 = vmatmul.mubr.bf16.vlgmr.msra.gmra.mrb[48].mxu0 %v1782_v2 }
 0x581   :  { %2027 = vmatprep.mubr.bf16.mxu1 %v1781_v26  ;;  %2602 = vmatprep.mubr.msk.f32.mxu0 %vm3021_vm4, %v3009_v3  ;;  %p2992_p3 = por %p2991_p2, %p2990_p1 }
 0x582   :  { %2028 = vmatmul.mubr.bf16.vlgmr.msra.gmra.mrb[24].mxu1 %v1780_v29  ;;  %2628 = vmatpush3.bf16.msra.mxu0 %v2627_v45 }
 0x583   :  { %2607 = vmatpush3.bf16.msra.mxu1 %v2606_v28  ;;  %2577 = vmatprep.mubr.msk.f32.mxu1 %vm3021_vm4, %v3009_v3  ;;  %p2993_p4 = pnand %p2992_p3, %p2986_p0 }
 0x584   :  { %2608 = vmatprep.subr.bf16.mxu1 %v3019_v59  ;;  %2629 = vmatprep.subr.bf16.mxu0 %v3019_v59 }
 0x586   :  { %2631 = vmatpush3.bf16.msra.mxu0 %v2630_v16 }
 0x587   :  { %2610 = vmatpush3.bf16.msra.mxu1 %v2609_v30  ;;  %2632 = vmatprep.subr.bf16.mxu0 %v3019_v59 }
 0x588   :  { %2611 = vmatprep.subr.bf16.mxu1 %v3019_v59 }
 0x58a   :  { %2634 = vmatpush3.bf16.msra.mxu0 %v2633_v49 }
 0x58b   :  { %2613 = vmatpush3.bf16.msra.mxu1 %v2612_v7  ;;  %2635 = vmatprep.subr.bf16.mxu0 %v3019_v59 }
 0x58c   :  { %2614 = vmatprep.subr.bf16.mxu1 %v3019_v59 }
 0x58e   :  { %2637 = vmatpush3.bf16.msra.mxu0 %v2636_v55 }
 0x58f   :  { %2616 = vmatpush3.bf16.msra.mxu1 %v2615_v48  ;;  %2638 = vmatprep.subr.bf16.mxu0 %v3019_v59 }
 0x590   :  { %2617 = vmatprep.subr.bf16.mxu1 %v3019_v59 }
 0x592   :  { %2640 = vmatpush3.bf16.msra.mxu0 %v2639_v11 }
 0x593   :  { %2619 = vmatpush3.bf16.msra.mxu1 %v2618_v36  ;;  %2600 = vmatprep.subr.mxu0 %v3009_v3 }
 0x594   :  { %2620 = vmatprep.subr.bf16.mxu1 %v3019_v59 }
 0x596   :  { %2601 = vmatpush3.msk.msra.mxu0 %vm208_vm5, %v2190_v20 }
 0x597   :  { %2622 = vmatpush3.bf16.msra.mxu1 %v2621_v39 }
 0x598   :  { %2623 = vmatprep.subr.bf16.mxu1 %v3019_v59 }
 0x59b   :  { %2625 = vmatpush3.bf16.msra.mxu1 %v2624_v42 }
 0x59c   :  { %2575 = vmatprep.subr.mxu1 %v3009_v3  ;;  %v2494_v3 = vld [vmem:[%s4032_s12] ss:$0 sm:$0xff] }
 0x59f   :  { %2576 = vmatpush3.msra.mxu1 %v2098_v10 }
 0x653   :  { %v2070_v57 = vpop.f32.mrb[48].mxu0 }
 0x654   :  { %v2072_v58 = vpop.f32.mrb[49].mxu0 }
 0x655   :  { %v2513_v60 = vpop.f32.mrb[24].mxu1  ;;  %v2073_v61 = vpop.f32.mrb[50].mxu0 }
 0x656   :  { %v2514_v0 = vpop.f32.mrb[25].mxu1  ;;  %v2075_v1 = vpop.f32.mrb[51].mxu0 }
 0x657   :  { %v2515_v4 = vadd.f32 %v2514_v0, %v2513_v60  ;;  %v2516_v5 = vpop.f32.mrb[26].mxu1 }
 0x658   :  { %v2517_v6 = vpop.f32.mrb[27].mxu1 }
 0x659   :  { %v2030_v8 = vadd.f32 %v2515_v4, %v2465_v62  ;;  %v2518_v32 = vadd.f32 %v2517_v6, %v2516_v5 }
 0x65b   :  { %v2071_v12 = vadd.f32 %v2070_v57, %v2030_v8  ;;  %v2033_v13 = vadd.f32 %v2518_v32, %v2465_v62 }
 0x65d   :  { %v2077_v17 = vmax.f32 %v2071_v12, 0.0  ;;  %v2074_v59 = vadd.f32 %v2073_v61, %v2033_v13 }
 0x65f   :  { %v2078_v18 = vmax.f32 %v2074_v59, 0.0  ;;  %2080 = vst.msk [vmem:[#allocation5] sm:$0xff] %vm2079_vm6, %v2077_v17 }
 0x661   :  { %2082 = vst.msk [vmem:[#allocation5 + $0x8] sm:$0xf] %vm2081_vm8, %v2078_v18 }
 0x668   :  { %v2083_v9 = vld [vmem:[#allocation5] ss:$8 sm:$0x3] }
 0x669   :  { %2578 = vmatmul.mubr.msk.f32.vlgmr.msra.gmra.mrb[28].mxu1 %vm2079_vm6, %v2083_v9 }
 0x73c   :  { %v2175_v22 = vpop.f32.mrb[28].mxu1 }
 0x73d   :  { %v2176_v23 = vadd.f32 %v2492_v21, %v2175_v22  ;;  %v2579_v63 = vpop.f32.mrb[29].mxu1 }
 0x73f   :  { %v2179_v24 = vmax.f32 %v2176_v23, 0.0 }
 0x741   :  { %2603 = vmatmul.mubr.msk.f32.vlgmr.msra.gmra.mrb[52].mxu0 %vm265_vm7, %v2179_v24 }
 0x814   :  { %v2270_v2 = vpop.f32.mrb[52].mxu0 }
 0x815   :  { %v2271_v25 = vadd.f32 %v2494_v3, %v2270_v2  ;;  %v2604_v26 = vpop.f32.mrb[53].mxu0 }
 0x817   :  { %2275 = vst.msk [vmem:[#allocation6] sm:$0x3] %vm2274_vm9, %v2271_v25 }
 0x818   :  { %2996 = shalt.err (!%p2993_p4)
}
 0x819   :  { %s2997_s1 = scalar_lea.hbm %s4033_s13, 32 }
 0x81a   :  { %p2998_p5 = scmp.ne.s32.totalorder %s4033_s13, %s2997_s1  ;;  %p3001_p6 = scmp.lt.u32.totalorder %s2997_s1, %s4033_s13 }
 0x81c   :  { %p3003_p7 = pnand %p3001_p6, %p2998_p5 }
 0x81e   :  { %3006 = shalt.err (!%p3003_p7)
}
 0x81f   :  { %2285 = dma.vmem_to_hbm [thread:$0]  %s2283_s30, 32, %s4033_s13, [#allocation7]  }
 0x820   :  { %3007 = dma.done.wait [#allocation7], 32  }
 0x821   :  { %3008 = vsyncadd [#allocation7], 4294967264 }
 0x822   :  { %2289 = vsyncpa [#allocation7], 1 }

</bundles_post_ra>
